<compile_context>
chip_gen: v7x
topology: tpu7x:2x2x1
jax: 0.10.0
libtpu: 0.0.40
codegen_flags: <defaults>
</compile_context>

<pallas_src>
import functools

import jax
import jax.numpy as jnp
from jax import lax
from jax.experimental import pallas as pl
from jax.experimental.pallas import tpu as pltpu

EPS = 1e-5
VMEM_LIMIT = 32 * 1024 * 1024


# --------------------------------------------------------------------------- #
# Kernels
# --------------------------------------------------------------------------- #
def _conv1x1_stats_kernel(x_ref, w_ref, y_ref, st_ref):
    """y = x @ w  (bf16 operands, f32 acc) + per-tile BN partial stats."""
    y = jnp.dot(x_ref[...], w_ref[...], preferred_element_type=jnp.float32)
    y_ref[...] = y
    s = jnp.sum(y, axis=0, keepdims=True)
    sq = jnp.sum(y * y, axis=0, keepdims=True)
    st_ref[...] = jnp.concatenate([s, sq], axis=0)[None]          # (1, 2, C)


def _conv3x3_stats_kernel(y1p_ref, sc_ref, sh_ref, w2r_ref, y2_ref, st_ref):
    """Per image: folded BN1 + ReLU, 3x3 conv via im2col (single K=9C matmul),
    plus per-image BN2 partial stats."""
    _, Hp, Wp, C = y1p_ref.shape
    H, W = Hp - 2, Wp - 2

    y = y1p_ref[0]                                                  # (Hp, Wp, C)
    a = jnp.maximum(y * sc_ref[...].reshape(1, 1, C)
                    + sh_ref[...].reshape(1, 1, C), 0.0)
    # Zero the 1-px halo (padding was applied pre-BN, so the affine must be
    # masked back to exact zeros on the border).
    row = lax.broadcasted_iota(jnp.int32, (Hp, Wp, 1), 0)
    col = lax.broadcasted_iota(jnp.int32, (Hp, Wp, 1), 1)
    interior = (row >= 1) & (row <= H) & (col >= 1) & (col <= W)
    a = jnp.where(interior, a, 0.0)

    # im2col: 9 shifted taps -> (H*W, 9*C) slab -> one MXU matmul.
    taps = [a[kh:kh + H, kw:kw + W, :] for kh in range(3) for kw in range(3)]
    patches = jnp.concatenate(taps, axis=-1).reshape(H * W, 9 * C)
    patches = patches.astype(jnp.bfloat16)
    y2 = jnp.dot(patches, w2r_ref[...], preferred_element_type=jnp.float32)

    y2_ref[...] = y2.reshape(1, H, W, C)
    s = jnp.sum(y2, axis=0, keepdims=True)
    sq = jnp.sum(y2 * y2, axis=0, keepdims=True)
    st_ref[...] = jnp.concatenate([s, sq], axis=0)[None]


def _conv1x1_bn_stats_kernel(y_in_ref, sc_ref, sh_ref, w_ref, y_ref, st_ref):
    """Folded BN2 + ReLU, 1x1 expansion conv, per-tile BN3 partial stats."""
    a = jnp.maximum(y_in_ref[...] * sc_ref[...] + sh_ref[...], 0.0)
    a = a.astype(jnp.bfloat16)
    y = jnp.dot(a, w_ref[...], preferred_element_type=jnp.float32)
    y_ref[...] = y
    s = jnp.sum(y, axis=0, keepdims=True)
    sq = jnp.sum(y * y, axis=0, keepdims=True)
    st_ref[...] = jnp.concatenate([s, sq], axis=0)[None]


def _bn_add_relu_kernel(y3_ref, x_ref, sc_ref, sh_ref, o_ref):
    """Folded BN3 + identity residual + ReLU (lane-packed, 128-wide rows)."""
    o_ref[...] = jnp.maximum(
        y3_ref[...] * sc_ref[...] + sh_ref[...] + x_ref[...], 0.0)


# --------------------------------------------------------------------------- #
# Wrapper
# --------------------------------------------------------------------------- #
def _choose_tile(m, target, mult=8):
    """Largest divisor of m that is <= target and a multiple of `mult`."""
    if m <= mult or m % mult != 0:
        return m
    t = min(target, m)
    t -= t % mult
    t = max(t, mult)
    while m % t != 0:
        t -= mult
    return t


def _fold_bn(stats, gamma, beta, count):
    """Reduce per-tile (sum, sum_sq) partials -> per-channel scale/shift."""
    total = jnp.sum(stats, axis=0)                    # (2, C)
    mean = total[0] / count
    var = total[1] / count - mean * mean              # biased var (PyTorch BN fwd)
    scale = gamma * lax.rsqrt(var + EPS)
    shift = beta - mean * scale
    return scale.reshape(1, -1), shift.reshape(1, -1)


def resnet_block(x_nchw, params, *, row_tile=256):
    """PyTorch-style NCHW in / NCHW out ResNet bottleneck forward."""
    # TODO(synk): for production, fold the NCHW<->NHWC transposes into the
    # BlockSpec index_maps so the activation tensor skips one HBM round trip.
    x = jnp.transpose(x_nchw, (0, 2, 3, 1)).astype(jnp.float32)   # NCHW -> NHWC
    N, H, W, Cin = x.shape
    C = params["w1"].shape[1]
    Cexp = params["w3"].shape[1]
    assert Cexp == Cin, "identity shortcut needs in_channels == out_channels*4"
    M = N * H * W

    x2d = x.reshape(M, Cin)
    x_bf = x2d.astype(jnp.bfloat16)
    w1_bf = params["w1"].astype(jnp.bfloat16)
    w2r_bf = params["w2"].reshape(9 * C, C).astype(jnp.bfloat16)   # (kh,kw,c) order
    w3_bf = params["w3"].astype(jnp.bfloat16)

    cp = pltpu.CompilerParams(dimension_semantics=("parallel",),
                              vmem_limit_bytes=VMEM_LIMIT)

    # ---- stage 1: conv1 (1x1) + BN1 partial stats, row-tiled --------------
    tm = _choose_tile(M, row_tile)
    g1 = M // tm
    y1, st1 = pl.pallas_call(
        _conv1x1_stats_kernel,
        grid=(g1,),
        in_specs=[pl.BlockSpec((tm, Cin), lambda i: (i, 0)),
                  pl.BlockSpec((Cin, C), lambda i: (0, 0))],
        out_specs=[pl.BlockSpec((tm, C), lambda i: (i, 0)),
                   pl.BlockSpec((1, 2, C), lambda i: (i, 0, 0))],
        out_shape=(jax.ShapeDtypeStruct((M, C), jnp.float32),
                   jax.ShapeDtypeStruct((g1, 2, C), jnp.float32)),
        compiler_params=cp,
    )(x_bf, w1_bf)
    sc1, sh1 = _fold_bn(st1, params["g1"], params["b1"], M)

    # ---- stage 2: BN1+ReLU -> conv2 (3x3, im2col) + BN2 stats, per image ---
    y1_pad = jnp.pad(y1.reshape(N, H, W, C), ((0, 0), (1, 1), (1, 1), (0, 0)))
    y2, st2 = pl.pallas_call(
        _conv3x3_stats_kernel,
        grid=(N,),
        in_specs=[pl.BlockSpec((1, H + 2, W + 2, C), lambda n: (n, 0, 0, 0)),
                  pl.BlockSpec((1, C), lambda n: (0, 0)),
                  pl.BlockSpec((1, C), lambda n: (0, 0)),
                  pl.BlockSpec((9 * C, C), lambda n: (0, 0))],
        out_specs=[pl.BlockSpec((1, H, W, C), lambda n: (n, 0, 0, 0)),
                   pl.BlockSpec((1, 2, C), lambda n: (n, 0, 0))],
        out_shape=(jax.ShapeDtypeStruct((N, H, W, C), jnp.float32),
                   jax.ShapeDtypeStruct((N, 2, C), jnp.float32)),
        compiler_params=cp,
    )(y1_pad, sc1, sh1, w2r_bf)
    sc2, sh2 = _fold_bn(st2, params["g2"], params["b2"], M)

    # ---- stage 3: BN2+ReLU -> conv3 (1x1 expansion) + BN3 stats, row-tiled -
    y3, st3 = pl.pallas_call(
        _conv1x1_bn_stats_kernel,
        grid=(g1,),
        in_specs=[pl.BlockSpec((tm, C), lambda i: (i, 0)),
                  pl.BlockSpec((1, C), lambda i: (0, 0)),
                  pl.BlockSpec((1, C), lambda i: (0, 0)),
                  pl.BlockSpec((C, Cexp), lambda i: (0, 0))],
        out_specs=[pl.BlockSpec((tm, Cexp), lambda i: (i, 0)),
                   pl.BlockSpec((1, 2, Cexp), lambda i: (i, 0, 0))],
        out_shape=(jax.ShapeDtypeStruct((M, Cexp), jnp.float32),
                   jax.ShapeDtypeStruct((g1, 2, Cexp), jnp.float32)),
        compiler_params=cp,
    )(y2.reshape(M, C), sc2, sh2, w3_bf)
    sc3, sh3 = _fold_bn(st3, params["g3"], params["b3"], M)

    # ---- stage 4: BN3 + residual + ReLU, lane-dense packed rows ------------
    pack = 1
    if Cexp < 128 and 128 % Cexp == 0 and M % (128 // Cexp) == 0:
        pack = 128 // Cexp
    L = Cexp * pack
    Mp = M // pack
    td = _choose_tile(Mp, max(8, row_tile // pack))
    gd = Mp // td
    out_p = pl.pallas_call(
        _bn_add_relu_kernel,
        grid=(gd,),
        in_specs=[pl.BlockSpec((td, L), lambda i: (i, 0)),
                  pl.BlockSpec((td, L), lambda i: (i, 0)),
                  pl.BlockSpec((1, L), lambda i: (0, 0)),
                  pl.BlockSpec((1, L), lambda i: (0, 0))],
        out_specs=pl.BlockSpec((td, L), lambda i: (i, 0)),
        out_shape=jax.ShapeDtypeStruct((Mp, L), jnp.float32),
        compiler_params=cp,
    )(y3.reshape(Mp, L), x2d.reshape(Mp, L),
      jnp.tile(sc3, (1, pack)), jnp.tile(sh3, (1, pack)))

    out = out_p.reshape(N, H, W, Cexp)
    return jnp.transpose(out, (0, 3, 1, 2))                        # NHWC -> NCHW


# --------------------------------------------------------------------------- #
# Plain-JAX reference (f32, HIGHEST precision) for a sanity check
# --------------------------------------------------------------------------- #
def reference(x_nchw, params):
    x = jnp.transpose(x_nchw, (0, 2, 3, 1)).astype(jnp.float32)
    dn = ("NHWC", "HWIO", "NHWC")
    hp = lax.Precision.HIGHEST

    def bn(y, g, b):
        mean = y.mean(axis=(0, 1, 2), keepdims=True)
        var = ((y - mean) ** 2).mean(axis=(0, 1, 2), keepdims=True)
        return (y - mean) / jnp.sqrt(var + EPS) * g + b

    h = lax.conv_general_dilated(x, params["w1"][None, None], (1, 1), "VALID",
                                 dimension_numbers=dn, precision=hp)
    h = jnp.maximum(bn(h, params["g1"], params["b1"]), 0.0)
    h = lax.conv_general_dilated(h, params["w2"], (1, 1), "SAME",
                                 dimension_numbers=dn, precision=hp)
    h = jnp.maximum(bn(h, params["g2"], params["b2"]), 0.0)
    h = lax.conv_general_dilated(h, params["w3"][None, None], (1, 1), "VALID",
                                 dimension_numbers=dn, precision=hp)
    h = bn(h, params["g3"], params["b3"])
    out = jnp.maximum(h + x, 0.0)
    return jnp.transpose(out, (0, 3, 1, 2))


if __name__ == "__main__":
    # Small ResNet bottleneck: in_channels=32, out_channels=8 (expansion 4 -> 32),
    # stride=1, downsample=None; batch=2, spatial=8x8.
    N, Cin, H, W = 2, 32, 8, 8
    C = 8
    Cexp = 4 * C
    assert Cexp == Cin   # identity residual path

    key = jax.random.PRNGKey(0)
    ks = jax.random.split(key, 10)
    params = {
        "w1": 0.1 * jax.random.normal(ks[0], (Cin, C), jnp.float32),
        "w2": 0.1 * jax.random.normal(ks[1], (3, 3, C, C), jnp.float32),   # HWIO
        "w3": 0.1 * jax.random.normal(ks[2], (C, Cexp), jnp.float32),
        "g1": 1.0 + 0.1 * jax.random.normal(ks[3], (C,), jnp.float32),
        "b1": 0.1 * jax.random.normal(ks[4], (C,), jnp.float32),
        "g2": 1.0 + 0.1 * jax.random.normal(ks[5], (C,), jnp.float32),
        "b2": 0.1 * jax.random.normal(ks[6], (C,), jnp.float32),
        "g3": 1.0 + 0.1 * jax.random.normal(ks[7], (Cexp,), jnp.float32),
        "b3": 0.1 * jax.random.normal(ks[8], (Cexp,), jnp.float32),
    }
    x = jax.random.normal(ks[9], (N, Cin, H, W), jnp.float32)

    # row_tile=32 -> 4-step row grids at this toy shape (exercises pipelining
    # and the cross-tile BN partial-stat reduction).
    fn = jax.jit(functools.partial(resnet_block, row_tile=32))
    out = jax.block_until_ready(fn(x, params))

    ref = reference(x, params)
    err = float(jnp.max(jnp.abs(out - ref)))
    assert out.shape == (N, Cexp, H, W)
    # bf16 matmul operands vs an f32 HIGHEST-precision reference.
    assert err < 1e-1, f"max abs diff {err}"
    print("KERNEL_OK")
</pallas_src>

<mosaic_0001>
module attributes {stable_mosaic.version = 11 : i64} {
  func.func @_conv1x1_stats_kernel(%arg0: i32, %arg1: memref<32x32xbf16, #tpu.memory_space<vmem>>, %arg2: memref<32x8xbf16, #tpu.memory_space<vmem>>, %arg3: memref<32x8xf32, #tpu.memory_space<vmem>>, %arg4: memref<1x2x8xf32, #tpu.memory_space<vmem>>) attributes {dimension_semantics = [#tpu.dimension_semantics<parallel>], iteration_bounds = array<i64: 4>, scalar_prefetch = 0 : i64, scratch_operands = 0 : i64, tpu.core_type = #tpu.core_type<tc>, window_params = [{transform_indices = @transform_0, window_bounds = array<i64: 32, 32>}, {pipeline_mode = #tpu.pipeline_mode<synchronous>, transform_indices = @transform_1, window_bounds = array<i64: 32, 8>}, {transform_indices = @transform_2, window_bounds = array<i64: 32, 8>}, {transform_indices = @transform_3, window_bounds = array<i64: 1, 2, 8>}]} {
    %c0 = arith.constant 0 : index
    %c0_0 = arith.constant 0 : index
    %0 = vector.load %arg1[%c0, %c0_0] : memref<32x32xbf16, #tpu.memory_space<vmem>>, vector<32x32xbf16>
    %c0_1 = arith.constant 0 : index
    %c0_2 = arith.constant 0 : index
    %1 = vector.load %arg2[%c0_1, %c0_2] : memref<32x8xbf16, #tpu.memory_space<vmem>>, vector<32x8xbf16>
    %cst = arith.constant dense<0.000000e+00> : vector<32x8xf32>
    %2 = tpu.matmul %0, %1, %cst {dimension_numbers = #tpu.dot_dimension_numbers<[1], [0], [0], [1], [0, 0, 1, 1], [], []>} : vector<32x32xbf16>, vector<32x8xbf16>, vector<32x8xf32> -> vector<32x8xf32>
    %c0_3 = arith.constant 0 : index
    %c0_4 = arith.constant 0 : index
    %3 = vector.load %arg3[%c0_3, %c0_4] : memref<32x8xf32, #tpu.memory_space<vmem>>, vector<32x8xf32>
    tpu.vector_store %arg3[%c0_3, %c0_4], %2 {strides = array<i32>} : memref<32x8xf32, #tpu.memory_space<vmem>>, vector<32x8xf32>,
    %cst_5 = arith.constant dense<0.000000e+00> : vector<8xf32>
    %4 = vector.multi_reduction <add>, %2, %cst_5 [0] : vector<32x8xf32> to vector<8xf32>
    %5 = vector.shape_cast %4 : vector<8xf32> to vector<1x8xf32>
    %6 = arith.mulf %2, %2 : vector<32x8xf32>
    %cst_6 = arith.constant dense<0.000000e+00> : vector<8xf32>
    %7 = vector.multi_reduction <add>, %6, %cst_6 [0] : vector<32x8xf32> to vector<8xf32>
    %8 = vector.shape_cast %7 : vector<8xf32> to vector<1x8xf32>
    %9 = tpu.concatenate %5, %8 in 0 : vector<1x8xf32>, vector<1x8xf32> -> vector<2x8xf32>
    %10 = vector.shape_cast %9 : vector<2x8xf32> to vector<1x2x8xf32>
    %c0_7 = arith.constant 0 : index
    %c0_8 = arith.constant 0 : index
    %c0_9 = arith.constant 0 : index
    %11 = vector.load %arg4[%c0_7, %c0_8, %c0_9] : memref<1x2x8xf32, #tpu.memory_space<vmem>>, vector<1x2x8xf32>
    tpu.vector_store %arg4[%c0_7, %c0_8, %c0_9], %10 {strides = array<i32>} : memref<1x2x8xf32, #tpu.memory_space<vmem>>, vector<1x2x8xf32>,
    return
  }
  func.func @transform_0(%arg0: i32) -> (i32, i32) {
    %c0_i32 = arith.constant 0 : i32
    %c0_i32_0 = arith.constant 0 : i32
    return %arg0, %c0_i32 : i32, i32
  }
  func.func @transform_1(%arg0: i32) -> (i32, i32) {
    %c0_i32 = arith.constant 0 : i32
    %c0_i32_0 = arith.constant 0 : i32
    %c0_i32_1 = arith.constant 0 : i32
    return %c0_i32, %c0_i32_0 : i32, i32
  }
  func.func @transform_2(%arg0: i32) -> (i32, i32) {
    %c0_i32 = arith.constant 0 : i32
    %c0_i32_0 = arith.constant 0 : i32
    return %arg0, %c0_i32 : i32, i32
  }
  func.func @transform_3(%arg0: i32) -> (i32, i32, i32) {
    %c0_i32 = arith.constant 0 : i32
    %c0_i32_0 = arith.constant 0 : i32
    %c0_i32_1 = arith.constant 0 : i32
    return %arg0, %c0_i32, %c0_i32_0 : i32, i32, i32
  }
}

module attributes {stable_mosaic.version = 11 : i64} {
  func.func @_conv3x3_stats_kernel(%arg0: i32, %arg1: memref<1x10x10x8xf32, #tpu.memory_space<vmem>>, %arg2: memref<1x8xf32, #tpu.memory_space<vmem>>, %arg3: memref<1x8xf32, #tpu.memory_space<vmem>>, %arg4: memref<72x8xbf16, #tpu.memory_space<vmem>>, %arg5: memref<1x8x8x8xf32, #tpu.memory_space<vmem>>, %arg6: memref<1x2x8xf32, #tpu.memory_space<vmem>>) attributes {dimension_semantics = [#tpu.dimension_semantics<parallel>], iteration_bounds = array<i64: 2>, scalar_prefetch = 0 : i64, scratch_operands = 0 : i64, tpu.core_type = #tpu.core_type<tc>, window_params = [{transform_indices = @transform_0, window_bounds = array<i64: 1, 10, 10, 8>}, {pipeline_mode = #tpu.pipeline_mode<synchronous>, transform_indices = @transform_1, window_bounds = array<i64: 1, 8>}, {pipeline_mode = #tpu.pipeline_mode<synchronous>, transform_indices = @transform_2, window_bounds = array<i64: 1, 8>}, {pipeline_mode = #tpu.pipeline_mode<synchronous>, transform_indices = @transform_3, window_bounds = array<i64: 72, 8>}, {transform_indices = @transform_4, window_bounds = array<i64: 1, 8, 8, 8>}, {transform_indices = @transform_5, window_bounds = array<i64: 1, 2, 8>}]} {
    %c0 = arith.constant 0 : index
    %c0_0 = arith.constant 0 : index
    %c0_1 = arith.constant 0 : index
    %c0_2 = arith.constant 0 : index
    %0 = vector.load %arg1[%c0, %c0_0, %c0_1, %c0_2] : memref<1x10x10x8xf32, #tpu.memory_space<vmem>>, vector<1x10x10x8xf32>
    %1 = vector.shape_cast %0 : vector<1x10x10x8xf32> to vector<10x10x8xf32>
    %c0_3 = arith.constant 0 : index
    %c0_4 = arith.constant 0 : index
    %2 = vector.load %arg2[%c0_3, %c0_4] : memref<1x8xf32, #tpu.memory_space<vmem>>, vector<1x8xf32>
    %3 = vector.shape_cast %2 : vector<1x8xf32> to vector<1x1x8xf32>
    %4 = vector.broadcast %3 : vector<1x1x8xf32> to vector<10x10x8xf32>
    %5 = arith.mulf %1, %4 : vector<10x10x8xf32>
    %c0_5 = arith.constant 0 : index
    %c0_6 = arith.constant 0 : index
    %6 = vector.load %arg3[%c0_5, %c0_6] : memref<1x8xf32, #tpu.memory_space<vmem>>, vector<1x8xf32>
    %7 = vector.shape_cast %6 : vector<1x8xf32> to vector<1x1x8xf32>
    %8 = vector.broadcast %7 : vector<1x1x8xf32> to vector<10x10x8xf32>
    %9 = arith.addf %5, %8 : vector<10x10x8xf32>
    %cst = arith.constant 0.000000e+00 : f32
    %10 = vector.broadcast %cst : f32 to vector<10x10x8xf32>
    %11 = arith.maximumf %9, %10 : vector<10x10x8xf32>
    %12 = tpu.iota {dimensions = array<i32: 0>} : vector<10x10x1xi32>
    %13 = tpu.iota {dimensions = array<i32: 1>} : vector<10x10x1xi32>
    %c1_i32 = arith.constant 1 : i32
    %14 = vector.broadcast %c1_i32 : i32 to vector<10x10x1xi32>
    %15 = arith.cmpi sge, %12, %14 : vector<10x10x1xi32>
    %c8_i32 = arith.constant 8 : i32
    %16 = vector.broadcast %c8_i32 : i32 to vector<10x10x1xi32>
    %17 = arith.cmpi sle, %12, %16 : vector<10x10x1xi32>
    %18 = arith.andi %15, %17 : vector<10x10x1xi1>
    %c1_i32_7 = arith.constant 1 : i32
    %19 = vector.broadcast %c1_i32_7 : i32 to vector<10x10x1xi32>
    %20 = arith.cmpi sge, %13, %19 : vector<10x10x1xi32>
    %21 = arith.andi %18, %20 : vector<10x10x1xi1>
    %c8_i32_8 = arith.constant 8 : i32
    %22 = vector.broadcast %c8_i32_8 : i32 to vector<10x10x1xi32>
    %23 = arith.cmpi sle, %13, %22 : vector<10x10x1xi32>
    %24 = arith.andi %21, %23 : vector<10x10x1xi1>
    %cst_9 = arith.constant 0.000000e+00 : f32
    %25 = vector.shape_cast %24 : vector<10x10x1xi1> to vector<10x10x1xi1>
    %26 = vector.broadcast %25 : vector<10x10x1xi1> to vector<10x10x8xi1>
    %27 = vector.broadcast %cst_9 : f32 to vector<10x10x8xf32>
    %28 = arith.select %26, %11, %27 : vector<10x10x8xi1>, vector<10x10x8xf32>
    %29 = vector.extract_strided_slice %28 {offsets = [0, 0, 0], sizes = [8, 8, 8], strides = [1, 1, 1]} : vector<10x10x8xf32> to vector<8x8x8xf32>
    %30 = vector.extract_strided_slice %28 {offsets = [0, 1, 0], sizes = [8, 8, 8], strides = [1, 1, 1]} : vector<10x10x8xf32> to vector<8x8x8xf32>
    %31 = vector.extract_strided_slice %28 {offsets = [0, 2, 0], sizes = [8, 8, 8], strides = [1, 1, 1]} : vector<10x10x8xf32> to vector<8x8x8xf32>
    %32 = vector.extract_strided_slice %28 {offsets = [1, 0, 0], sizes = [8, 8, 8], strides = [1, 1, 1]} : vector<10x10x8xf32> to vector<8x8x8xf32>
    %33 = vector.extract_strided_slice %28 {offsets = [1, 1, 0], sizes = [8, 8, 8], strides = [1, 1, 1]} : vector<10x10x8xf32> to vector<8x8x8xf32>
    %34 = vector.extract_strided_slice %28 {offsets = [1, 2, 0], sizes = [8, 8, 8], strides = [1, 1, 1]} : vector<10x10x8xf32> to vector<8x8x8xf32>
    %35 = vector.extract_strided_slice %28 {offsets = [2, 0, 0], sizes = [8, 8, 8], strides = [1, 1, 1]} : vector<10x10x8xf32> to vector<8x8x8xf32>
    %36 = vector.extract_strided_slice %28 {offsets = [2, 1, 0], sizes = [8, 8, 8], strides = [1, 1, 1]} : vector<10x10x8xf32> to vector<8x8x8xf32>
    %37 = vector.extract_strided_slice %28 {offsets = [2, 2, 0], sizes = [8, 8, 8], strides = [1, 1, 1]} : vector<10x10x8xf32> to vector<8x8x8xf32>
    %38 = tpu.concatenate %29, %30, %31, %32, %33, %34, %35, %36, %37 in 2 : vector<8x8x8xf32>, vector<8x8x8xf32>, vector<8x8x8xf32>, vector<8x8x8xf32>, vector<8x8x8xf32>, vector<8x8x8xf32>, vector<8x8x8xf32>, vector<8x8x8xf32>, vector<8x8x8xf32> -> vector<8x8x72xf32>
    %39 = vector.shape_cast %38 : vector<8x8x72xf32> to vector<64x72xf32>
    %40 = arith.truncf %39 : vector<64x72xf32> to vector<64x72xbf16>
    %c0_10 = arith.constant 0 : index
    %c0_11 = arith.constant 0 : index
    %41 = vector.load %arg4[%c0_10, %c0_11] : memref<72x8xbf16, #tpu.memory_space<vmem>>, vector<72x8xbf16>
    %cst_12 = arith.constant dense<0.000000e+00> : vector<64x8xf32>
    %42 = tpu.matmul %40, %41, %cst_12 {dimension_numbers = #tpu.dot_dimension_numbers<[1], [0], [0], [1], [0, 0, 1, 1], [], []>} : vector<64x72xbf16>, vector<72x8xbf16>, vector<64x8xf32> -> vector<64x8xf32>
    %43 = vector.shape_cast %42 : vector<64x8xf32> to vector<1x8x8x8xf32>
    %c0_13 = arith.constant 0 : index
    %c0_14 = arith.constant 0 : index
    %c0_15 = arith.constant 0 : index
    %c0_16 = arith.constant 0 : index
    %44 = vector.load %arg5[%c0_13, %c0_14, %c0_15, %c0_16] : memref<1x8x8x8xf32, #tpu.memory_space<vmem>>, vector<1x8x8x8xf32>
    tpu.vector_store %arg5[%c0_13, %c0_14, %c0_15, %c0_16], %43 {strides = array<i32>} : memref<1x8x8x8xf32, #tpu.memory_space<vmem>>, vector<1x8x8x8xf32>,
    %cst_17 = arith.constant dense<0.000000e+00> : vector<8xf32>
    %45 = vector.multi_reduction <add>, %42, %cst_17 [0] : vector<64x8xf32> to vector<8xf32>
    %46 = vector.shape_cast %45 : vector<8xf32> to vector<1x8xf32>
    %47 = arith.mulf %42, %42 : vector<64x8xf32>
    %cst_18 = arith.constant dense<0.000000e+00> : vector<8xf32>
    %48 = vector.multi_reduction <add>, %47, %cst_18 [0] : vector<64x8xf32> to vector<8xf32>
    %49 = vector.shape_cast %48 : vector<8xf32> to vector<1x8xf32>
    %50 = tpu.concatenate %46, %49 in 0 : vector<1x8xf32>, vector<1x8xf32> -> vector<2x8xf32>
    %51 = vector.shape_cast %50 : vector<2x8xf32> to vector<1x2x8xf32>
    %c0_19 = arith.constant 0 : index
    %c0_20 = arith.constant 0 : index
    %c0_21 = arith.constant 0 : index
    %52 = vector.load %arg6[%c0_19, %c0_20, %c0_21] : memref<1x2x8xf32, #tpu.memory_space<vmem>>, vector<1x2x8xf32>
    tpu.vector_store %arg6[%c0_19, %c0_20, %c0_21], %51 {strides = array<i32>} : memref<1x2x8xf32, #tpu.memory_space<vmem>>, vector<1x2x8xf32>,
    return
  }
  func.func @transform_0(%arg0: i32) -> (i32, i32, i32, i32) {
    %c0_i32 = arith.constant 0 : i32
    %c0_i32_0 = arith.constant 0 : i32
    %c0_i32_1 = arith.constant 0 : i32
    %c0_i32_2 = arith.constant 0 : i32
    return %arg0, %c0_i32, %c0_i32_0, %c0_i32_1 : i32, i32, i32, i32
  }
  func.func @transform_1(%arg0: i32) -> (i32, i32) {
    %c0_i32 = arith.constant 0 : i32
    %c0_i32_0 = arith.constant 0 : i32
    %c0_i32_1 = arith.constant 0 : i32
    return %c0_i32, %c0_i32_0 : i32, i32
  }
  func.func @transform_2(%arg0: i32) -> (i32, i32) {
    %c0_i32 = arith.constant 0 : i32
    %c0_i32_0 = arith.constant 0 : i32
    %c0_i32_1 = arith.constant 0 : i32
    return %c0_i32, %c0_i32_0 : i32, i32
  }
  func.func @transform_3(%arg0: i32) -> (i32, i32) {
    %c0_i32 = arith.constant 0 : i32
    %c0_i32_0 = arith.constant 0 : i32
    %c0_i32_1 = arith.constant 0 : i32
    return %c0_i32, %c0_i32_0 : i32, i32
  }
  func.func @transform_4(%arg0: i32) -> (i32, i32, i32, i32) {
    %c0_i32 = arith.constant 0 : i32
    %c0_i32_0 = arith.constant 0 : i32
    %c0_i32_1 = arith.constant 0 : i32
    %c0_i32_2 = arith.constant 0 : i32
    return %arg0, %c0_i32, %c0_i32_0, %c0_i32_1 : i32, i32, i32, i32
  }
  func.func @transform_5(%arg0: i32) -> (i32, i32, i32) {
    %c0_i32 = arith.constant 0 : i32
    %c0_i32_0 = arith.constant 0 : i32
    %c0_i32_1 = arith.constant 0 : i32
    return %arg0, %c0_i32, %c0_i32_0 : i32, i32, i32
  }
}

module attributes {stable_mosaic.version = 11 : i64} {
  func.func @_conv1x1_bn_stats_kernel(%arg0: i32, %arg1: memref<32x8xf32, #tpu.memory_space<vmem>>, %arg2: memref<1x8xf32, #tpu.memory_space<vmem>>, %arg3: memref<1x8xf32, #tpu.memory_space<vmem>>, %arg4: memref<8x32xbf16, #tpu.memory_space<vmem>>, %arg5: memref<32x32xf32, #tpu.memory_space<vmem>>, %arg6: memref<1x2x32xf32, #tpu.memory_space<vmem>>) attributes {dimension_semantics = [#tpu.dimension_semantics<parallel>], iteration_bounds = array<i64: 4>, scalar_prefetch = 0 : i64, scratch_operands = 0 : i64, tpu.core_type = #tpu.core_type<tc>, window_params = [{transform_indices = @transform_0, window_bounds = array<i64: 32, 8>}, {pipeline_mode = #tpu.pipeline_mode<synchronous>, transform_indices = @transform_1, window_bounds = array<i64: 1, 8>}, {pipeline_mode = #tpu.pipeline_mode<synchronous>, transform_indices = @transform_2, window_bounds = array<i64: 1, 8>}, {pipeline_mode = #tpu.pipeline_mode<synchronous>, transform_indices = @transform_3, window_bounds = array<i64: 8, 32>}, {transform_indices = @transform_4, window_bounds = array<i64: 32, 32>}, {transform_indices = @transform_5, window_bounds = array<i64: 1, 2, 32>}]} {
    %c0 = arith.constant 0 : index
    %c0_0 = arith.constant 0 : index
    %0 = vector.load %arg1[%c0, %c0_0] : memref<32x8xf32, #tpu.memory_space<vmem>>, vector<32x8xf32>
    %c0_1 = arith.constant 0 : index
    %c0_2 = arith.constant 0 : index
    %1 = vector.load %arg2[%c0_1, %c0_2] : memref<1x8xf32, #tpu.memory_space<vmem>>, vector<1x8xf32>
    %2 = vector.broadcast %1 : vector<1x8xf32> to vector<32x8xf32>
    %3 = arith.mulf %0, %2 : vector<32x8xf32>
    %c0_3 = arith.constant 0 : index
    %c0_4 = arith.constant 0 : index
    %4 = vector.load %arg3[%c0_3, %c0_4] : memref<1x8xf32, #tpu.memory_space<vmem>>, vector<1x8xf32>
    %5 = vector.broadcast %4 : vector<1x8xf32> to vector<32x8xf32>
    %6 = arith.addf %3, %5 : vector<32x8xf32>
    %cst = arith.constant 0.000000e+00 : f32
    %7 = vector.broadcast %cst : f32 to vector<32x8xf32>
    %8 = arith.maximumf %6, %7 : vector<32x8xf32>
    %9 = arith.truncf %8 : vector<32x8xf32> to vector<32x8xbf16>
    %c0_5 = arith.constant 0 : index
    %c0_6 = arith.constant 0 : index
    %10 = vector.load %arg4[%c0_5, %c0_6] : memref<8x32xbf16, #tpu.memory_space<vmem>>, vector<8x32xbf16>
    %cst_7 = arith.constant dense<0.000000e+00> : vector<32x32xf32>
    %11 = tpu.matmul %9, %10, %cst_7 {dimension_numbers = #tpu.dot_dimension_numbers<[1], [0], [0], [1], [0, 0, 1, 1], [], []>} : vector<32x8xbf16>, vector<8x32xbf16>, vector<32x32xf32> -> vector<32x32xf32>
    %c0_8 = arith.constant 0 : index
    %c0_9 = arith.constant 0 : index
    %12 = vector.load %arg5[%c0_8, %c0_9] : memref<32x32xf32, #tpu.memory_space<vmem>>, vector<32x32xf32>
    tpu.vector_store %arg5[%c0_8, %c0_9], %11 {strides = array<i32>} : memref<32x32xf32, #tpu.memory_space<vmem>>, vector<32x32xf32>,
    %cst_10 = arith.constant dense<0.000000e+00> : vector<32xf32>
    %13 = vector.multi_reduction <add>, %11, %cst_10 [0] : vector<32x32xf32> to vector<32xf32>
    %14 = vector.shape_cast %13 : vector<32xf32> to vector<1x32xf32>
    %15 = arith.mulf %11, %11 : vector<32x32xf32>
    %cst_11 = arith.constant dense<0.000000e+00> : vector<32xf32>
    %16 = vector.multi_reduction <add>, %15, %cst_11 [0] : vector<32x32xf32> to vector<32xf32>
    %17 = vector.shape_cast %16 : vector<32xf32> to vector<1x32xf32>
    %18 = tpu.concatenate %14, %17 in 0 : vector<1x32xf32>, vector<1x32xf32> -> vector<2x32xf32>
    %19 = vector.shape_cast %18 : vector<2x32xf32> to vector<1x2x32xf32>
    %c0_12 = arith.constant 0 : index
    %c0_13 = arith.constant 0 : index
    %c0_14 = arith.constant 0 : index
    %20 = vector.load %arg6[%c0_12, %c0_13, %c0_14] : memref<1x2x32xf32, #tpu.memory_space<vmem>>, vector<1x2x32xf32>
    tpu.vector_store %arg6[%c0_12, %c0_13, %c0_14], %19 {strides = array<i32>} : memref<1x2x32xf32, #tpu.memory_space<vmem>>, vector<1x2x32xf32>,
    return
  }
  func.func @transform_0(%arg0: i32) -> (i32, i32) {
    %c0_i32 = arith.constant 0 : i32
    %c0_i32_0 = arith.constant 0 : i32
    return %arg0, %c0_i32 : i32, i32
  }
  func.func @transform_1(%arg0: i32) -> (i32, i32) {
    %c0_i32 = arith.constant 0 : i32
    %c0_i32_0 = arith.constant 0 : i32
    %c0_i32_1 = arith.constant 0 : i32
    return %c0_i32, %c0_i32_0 : i32, i32
  }
  func.func @transform_2(%arg0: i32) -> (i32, i32) {
    %c0_i32 = arith.constant 0 : i32
    %c0_i32_0 = arith.constant 0 : i32
    %c0_i32_1 = arith.constant 0 : i32
    return %c0_i32, %c0_i32_0 : i32, i32
  }
  func.func @transform_3(%arg0: i32) -> (i32, i32) {
    %c0_i32 = arith.constant 0 : i32
    %c0_i32_0 = arith.constant 0 : i32
    %c0_i32_1 = arith.constant 0 : i32
    return %c0_i32, %c0_i32_0 : i32, i32
  }
  func.func @transform_4(%arg0: i32) -> (i32, i32) {
    %c0_i32 = arith.constant 0 : i32
    %c0_i32_0 = arith.constant 0 : i32
    return %arg0, %c0_i32 : i32, i32
  }
  func.func @transform_5(%arg0: i32) -> (i32, i32, i32) {
    %c0_i32 = arith.constant 0 : i32
    %c0_i32_0 = arith.constant 0 : i32
    %c0_i32_1 = arith.constant 0 : i32
    return %arg0, %c0_i32, %c0_i32_0 : i32, i32, i32
  }
}

module attributes {stable_mosaic.version = 11 : i64} {
  func.func @_bn_add_relu_kernel(%arg0: i32, %arg1: memref<8x128xf32, #tpu.memory_space<vmem>>, %arg2: memref<8x128xf32, #tpu.memory_space<vmem>>, %arg3: memref<1x128xf32, #tpu.memory_space<vmem>>, %arg4: memref<1x128xf32, #tpu.memory_space<vmem>>, %arg5: memref<8x128xf32, #tpu.memory_space<vmem>>) attributes {dimension_semantics = [#tpu.dimension_semantics<parallel>], iteration_bounds = array<i64: 4>, scalar_prefetch = 0 : i64, scratch_operands = 0 : i64, tpu.core_type = #tpu.core_type<tc>, window_params = [{transform_indices = @transform_0, window_bounds = array<i64: 8, 128>}, {transform_indices = @transform_1, window_bounds = array<i64: 8, 128>}, {pipeline_mode = #tpu.pipeline_mode<synchronous>, transform_indices = @transform_2, window_bounds = array<i64: 1, 128>}, {pipeline_mode = #tpu.pipeline_mode<synchronous>, transform_indices = @transform_3, window_bounds = array<i64: 1, 128>}, {transform_indices = @transform_4, window_bounds = array<i64: 8, 128>}]} {
    %c0 = arith.constant 0 : index
    %c0_0 = arith.constant 0 : index
    %0 = vector.load %arg1[%c0, %c0_0] : memref<8x128xf32, #tpu.memory_space<vmem>>, vector<8x128xf32>
    %c0_1 = arith.constant 0 : index
    %c0_2 = arith.constant 0 : index
    %1 = vector.load %arg3[%c0_1, %c0_2] : memref<1x128xf32, #tpu.memory_space<vmem>>, vector<1x128xf32>
    %2 = vector.broadcast %1 : vector<1x128xf32> to vector<8x128xf32>
    %3 = arith.mulf %0, %2 : vector<8x128xf32>
    %c0_3 = arith.constant 0 : index
    %c0_4 = arith.constant 0 : index
    %4 = vector.load %arg4[%c0_3, %c0_4] : memref<1x128xf32, #tpu.memory_space<vmem>>, vector<1x128xf32>
    %5 = vector.broadcast %4 : vector<1x128xf32> to vector<8x128xf32>
    %6 = arith.addf %3, %5 : vector<8x128xf32>
    %c0_5 = arith.constant 0 : index
    %c0_6 = arith.constant 0 : index
    %7 = vector.load %arg2[%c0_5, %c0_6] : memref<8x128xf32, #tpu.memory_space<vmem>>, vector<8x128xf32>
    %8 = arith.addf %6, %7 : vector<8x128xf32>
    %cst = arith.constant 0.000000e+00 : f32
    %9 = vector.broadcast %cst : f32 to vector<8x128xf32>
    %10 = arith.maximumf %8, %9 : vector<8x128xf32>
    %c0_7 = arith.constant 0 : index
    %c0_8 = arith.constant 0 : index
    %11 = vector.load %arg5[%c0_7, %c0_8] : memref<8x128xf32, #tpu.memory_space<vmem>>, vector<8x128xf32>
    tpu.vector_store %arg5[%c0_7, %c0_8], %10 {strides = array<i32>} : memref<8x128xf32, #tpu.memory_space<vmem>>, vector<8x128xf32>,
    return
  }
  func.func @transform_0(%arg0: i32) -> (i32, i32) {
    %c0_i32 = arith.constant 0 : i32
    %c0_i32_0 = arith.constant 0 : i32
    return %arg0, %c0_i32 : i32, i32
  }
  func.func @transform_1(%arg0: i32) -> (i32, i32) {
    %c0_i32 = arith.constant 0 : i32
    %c0_i32_0 = arith.constant 0 : i32
    return %arg0, %c0_i32 : i32, i32
  }
  func.func @transform_2(%arg0: i32) -> (i32, i32) {
    %c0_i32 = arith.constant 0 : i32
    %c0_i32_0 = arith.constant 0 : i32
    %c0_i32_1 = arith.constant 0 : i32
    return %c0_i32, %c0_i32_0 : i32, i32
  }
  func.func @transform_3(%arg0: i32) -> (i32, i32) {
    %c0_i32 = arith.constant 0 : i32
    %c0_i32_0 = arith.constant 0 : i32
    %c0_i32_1 = arith.constant 0 : i32
    return %c0_i32, %c0_i32_0 : i32, i32
  }
  func.func @transform_4(%arg0: i32) -> (i32, i32) {
    %c0_i32 = arith.constant 0 : i32
    %c0_i32_0 = arith.constant 0 : i32
    return %arg0, %c0_i32 : i32, i32
  }
}

</mosaic_0001>

<bundles_post_ra>
// kernel: resnet_block.4
= control target key start
LH: loop header
LB: loop body
LE: loop exit
PB: predicated region body
PF: predicated region fallthrough
CT: control target
= control target key end

     0   :  { %s468_s12 = smov 0   ;;  %s511_s0 = inlined_call_operand.vmem [shape: bf16[128,32], index: 0, kind: input, shape index: {}]   ;;  %s512_s1 = inlined_call_operand.vmem [shape: bf16[32,8], index: 1, kind: input, shape index: {}]   ;;  %s513_s2 = inlined_call_operand.vmem [shape: f32[128,8], index: 2, kind: output, shape index: {0}]   ;;  %s514_s3 = inlined_call_operand.vmem [shape: f32[4,2,8], index: 3, kind: output, shape index: {1}]  }
   0x1 LB: > { %s474_s13 = sadd.s32 4294967295, %s446_s12   ;;  %p402_p0 = scmp.ge.s32.totalorder %s446_s12, 1  ;;  %s446_s12 = sphi %s468_s12, %s14_s12  }
   0x2   : > { %p141_p1 = scmp.lt.s32.totalorder %s446_s12, 5 }
   0x4   : > { %p142_p2 = pnand %p402_p0, %p141_p1 }
   0x5   : > { %v436_v0 = vld [vmem:[%s512_s1] sm:$0xff] (!%p142_p2)   ;;  %s403_s16 = sshll.u32 (!%p142_p2), %s474_s13, 2  ;;  %v437_v1 = vld [vmem:[%s512_s1 + $0x8] sm:$0xff] (!%p142_p2)   ;;  %vm216_vm0 = vcmask (!%p142_p2), 261120   ;;  %vm272_vm1 = vcmask (!%p142_p2), 64512   ;;  %p181_p4 = scmp.lt.s32.totalorder (!%p142_p2), %s474_s13, 3 }
   0x6   : > { %145 = sbr.rel (%p142_p2) target bundleno = 256 (0x100), region = 28  ;;  %p170_p3 = scmp.lt.s32.totalorder (!%p142_p2), %s403_s16, 15  ;;  %420 = vmatprep.subr.bf16.mxu0 (!%p142_p2), %v436_v0  ;;  %vm307_vm2 = vcmask (!%p142_p2), 1040384   ;;  %vm309_vm3 = vcmask (!%p142_p2), 58368  }
   0x7   : > { %421 = vmatpush3.bf16.msra.mxu0 (!%p142_p2), %v436_v0 }
   0x8   : > { %422 = vmatprep.subr.bf16.mxu0 (!%p142_p2), %v437_v1 }
   0xb   : > { %423 = vmatpush3.bf16.msra.mxu0 (!%p142_p2), %v437_v1 }
   0xd   : > { %s516_s16 = smov (!%p170_p3, %s403_s16), 15  ;;  %s518_s13 = smov (!%p181_p4, %s474_s13), 3 }
   0xe   : > { %s404_s19 = sshll.u32 %s516_s16, 2  ;;  %s406_s23 = sshll.u32 %s516_s16, 3 }
   0xf   : > { %s173_s22 = scalar_lea.vmem %s511_s0, %s404_s19  ;;  %s179_s26 = scalar_lea.vmem %s513_s2, %s406_s23 }
  0x10   : > { %v438_v2 = vld [vmem:[%s173_s22] sm:$0xff]   ;;  %v439_v3 = vld [vmem:[%s173_s22 + $0x8] sm:$0xff]   ;;  %s407_s27 = sshll.u32 %s518_s13, 1 }
  0x11   : > { %424 = vmatprep.mubr.msk.bf16.mxu0 %vm216_vm0, %v438_v2  ;;  %s184_s30 = scalar_lea.vmem %s514_s3, %s407_s27 }
  0x12   : > { %425 = vmatmul.mubr.msk.bf16.vlgmr.msra.gmra.mrb[0].mxu0 %vm216_vm0, %v439_v3 }
  0xe5   : > { %v426_v4 = vpop.f32.mrb[0].mxu0 }
  0xe6   : > { %275 = vst.msk [vmem:[%s179_s26 + $0x10] sm:$0xff] %vm272_vm1, %v426_v4  ;;  %v257_v5 = vpop.f32.mrb[1].mxu0  ;;  %v292_v9 = vmul.f32 %v426_v4, %v426_v4  ;;  %v280_v14 = vsel %vm272_vm1, %v426_v4, 0.0 }
  0xe7   : > { %273 = vst.msk [vmem:[%s179_s26] sm:$0xff] %vm272_vm1, %v257_v5  ;;  %v290_v6 = vmul.f32 %v257_v5, %v257_v5  ;;  %v427_v7 = vpop.f32.mrb[2].mxu0  ;;  %v277_v10 = vsel %vm272_vm1, %v257_v5, 0.0 }
  0xe8   : > { %276 = vst.msk [vmem:[%s179_s26 + $0x18] sm:$0xff] %vm272_vm1, %v427_v7  ;;  %v260_v8 = vpop.f32.mrb[3].mxu0  ;;  %v293_v16 = vmul.f32 %v427_v7, %v427_v7  ;;  %v297_v20 = vsel %vm272_vm1, %v292_v9, 0.0  ;;  %v282_v21 = vsel %vm272_vm1, %v427_v7, 0.0 }
  0xe9   : > { %274 = vst.msk [vmem:[%s179_s26 + $0x8] sm:$0xff] %vm272_vm1, %v260_v8  ;;  %v278_v11 = vsel %vm272_vm1, %v260_v8, 0.0  ;;  %v291_v12 = vmul.f32 %v260_v8, %v260_v8  ;;  %v294_v15 = vsel %vm272_vm1, %v290_v6, 0.0 }
  0xea   : > { %v279_v13 = vadd.f32 %v278_v11, %v277_v10  ;;  %v299_v24 = vsel %vm272_vm1, %v293_v16, 0.0 }
  0xeb   : > { %v295_v17 = vsel %vm272_vm1, %v291_v12, 0.0 }
  0xec   : > { %v281_v18 = vadd.f32 %v280_v14, %v279_v13  ;;  %v296_v19 = vadd.f32 %v295_v17, %v294_v15 }
  0xee   : > { %v283_v22 = vadd.f32 %v282_v21, %v281_v18  ;;  %v298_v23 = vadd.f32 %v297_v20, %v296_v19 }
  0xf0   : > { %v284_v25 = vrot.slane %v283_v22, 4  ;;  %v300_v26 = vadd.f32 %v299_v24, %v298_v23 }
  0xf2   : > { %v285_v27 = vadd.f32 %v284_v25, %v283_v22  ;;  %v301_v28 = vrot.slane %v300_v26, 4 }
  0xf4   : > { %v286_v29 = vrot.slane %v285_v27, 2  ;;  %v302_v30 = vadd.f32 %v301_v28, %v300_v26 }
  0xf6   : > { %v287_v31 = vadd.f32 %v286_v29, %v285_v27  ;;  %v303_v32 = vrot.slane %v302_v30, 2 }
  0xf8   : > { %v288_v33 = vrot.slane %v287_v31, 1  ;;  %v304_v34 = vadd.f32 %v303_v32, %v302_v30 }
  0xfa   : > { %v305_v35 = vrot.slane %v304_v34, 1  ;;  %v289_v36 = vadd.f32 %v288_v33, %v287_v31 }
  0xfc   : > { %v306_v37 = vadd.f32 %v305_v35, %v304_v34 }
  0xfe   : > { %v308_v38 = vsel %vm307_vm2, %v289_v36, %v306_v37 }
  0xff   : > { %310 = vst.msk [vmem:[%s184_s30] sm:$0x3] %vm309_vm3, %v308_v38 }
 0x100 PF: > { %s14_s12 = sadd.s32 1, %s446_s12  }
 0x101   : > { %p11_p5 = scmp.ge.s32.totalorder %s14_s12, 6  }
 0x103   :  { %13 = sbr.rel (!%p11_p5) target bundleno = 1 (0x1), region = 70 }

// kernel: resnet_block.6
= control target key start
LH: loop header
LB: loop body
LE: loop exit
PB: predicated region body
PF: predicated region fallthrough
CT: control target
= control target key end

     0   :  { %s531_s18 = smov 0   ;;  %s577_s0 = inlined_call_operand.vmem [shape: f32[128,8], index: 0, kind: input, shape index: {}]   ;;  %s578_s1 = inlined_call_operand.vmem [shape: f32[1,8], index: 1, kind: input, shape index: {}]   ;;  %s579_s2 = inlined_call_operand.vmem [shape: f32[1,8], index: 2, kind: input, shape index: {}]   ;;  %s580_s3 = inlined_call_operand.vmem [shape: bf16[8,32], index: 3, kind: input, shape index: {}]   ;;  %s581_s4 = inlined_call_operand.vmem [shape: f32[128,32], index: 4, kind: output, shape index: {0}]   ;;  %s582_s5 = inlined_call_operand.vmem [shape: f32[4,2,32], index: 5, kind: output, shape index: {1}]  }
   0x1 LB: > { %s537_s19 = sadd.s32 4294967295, %s499_s18   ;;  %p463_p0 = scmp.ge.s32.totalorder %s499_s18, 1  ;;  %s499_s18 = sphi %s531_s18, %s16_s18  }
   0x2   : > { %p191_p1 = scmp.lt.s32.totalorder %s499_s18, 5 }
   0x4   : > { %p192_p2 = pnand %p463_p0, %p191_p1 }
   0x5   : > { %v272_v0 = vld [vmem:[%s580_s3] sm:$0xf] (!%p192_p2)  ;;  %vm280_vm0 = vcmask (!%p192_p2), 1043456   ;;  %s464_s22 = sshll.u32 (!%p192_p2), %s537_s19, 2  ;;  %vm273_vm1 = vcmask (!%p192_p2), 64512   ;;  %vm333_vm2 = vcmask (!%p192_p2), 261120  }
   0x6   : > { %195 = sbr.rel (%p192_p2) target bundleno = 264 (0x108), region = 36  ;;  %484 = vmatprep.subr.msk.bf16.mxu0 (!%p192_p2), %vm280_vm0, %v272_v0  ;;  %v282_v1 = vsel (!%p192_p2), %vm280_vm0, %v272_v0, 0  ;;  %p224_p3 = scmp.lt.s32.totalorder (!%p192_p2), %s464_s22, 15  ;;  %v469_v2 = vld [vmem:[%s578_s1] ss:$0 sm:$0xff] (!%p192_p2)  ;;  %vm368_vm3 = vcmask (!%p192_p2), 1040384  }
   0x7   : > { %479 = vmatpush3.bf16.msra.mxu0 (!%p192_p2), %v282_v1  ;;  %v470_v3 = vld [vmem:[%s579_s2] ss:$0 sm:$0xff] (!%p192_p2)  ;;  %p235_p4 = scmp.lt.s32.totalorder (!%p192_p2), %s537_s19, 3  ;;  %vm370_vm4 = vcmask (!%p192_p2), 254976  }
   0xd   : > { %s584_s22 = smov (!%p224_p3, %s464_s22), 15  ;;  %s586_s19 = smov (!%p235_p4, %s537_s19), 3 }
   0xe   : > { %s465_s23 = sshll.u32 %s584_s22, 3  ;;  %s468_s9 = sshll.u32 %s586_s19, 1 }
   0xf   : > { %s227_s28 = scalar_lea.vmem %s577_s0, %s465_s23  ;;  %s233_s8 = scalar_lea.vmem %s581_s4, %s465_s23 }
  0x10   : > { %v240_v4 = vld [vmem:[%s227_s28] sm:$0xff]  ;;  %v241_v5 = vld [vmem:[%s227_s28 + $0x8] sm:$0xff]  ;;  %v242_v6 = vld [vmem:[%s227_s28 + $0x10] sm:$0xff]  ;;  %s238_s12 = scalar_lea.vmem %s582_s5, %s468_s9 }
  0x11   : > { %v251_v7 = vmul.f32 %v469_v2, %v240_v4  ;;  %v252_v8 = vmul.f32 %v469_v2, %v241_v5  ;;  %v243_v9 = vld [vmem:[%s227_s28 + $0x18] sm:$0xff]  ;;  %v253_v10 = vmul.f32 %v469_v2, %v242_v6 }
  0x12   : > { %v254_v11 = vmul.f32 %v469_v2, %v243_v9 }
  0x13   : > { %v262_v12 = vadd.f32 %v470_v3, %v251_v7  ;;  %v263_v13 = vadd.f32 %v470_v3, %v252_v8  ;;  %v264_v14 = vadd.f32 %v470_v3, %v253_v10 }
  0x14   : > { %v265_v15 = vadd.f32 %v470_v3, %v254_v11 }
  0x15   : > { %v266_v16 = vmax.f32 %v262_v12, 0.0  ;;  %v267_v17 = vmax.f32 %v263_v13, 0.0  ;;  %v268_v18 = vmax.f32 %v264_v14, 0.0 }
  0x16   : > { %v269_v19 = vmax.f32 %v265_v15, 0.0 }
  0x17   : > { %v270_v20 = vpack.c.bf16 %v267_v17, %v266_v16 }
  0x18   : > { %v271_v21 = vpack.c.bf16 %v269_v19, %v268_v18 }
  0x19   : > { %480 = vmatprep.mubr.msk.bf16.mxu0 %vm273_vm1, %v270_v20 }
  0x1a   : > { %481 = vmatmul.mubr.msk.bf16.vlgmr.msra.gmra.mrb[0].mxu0 %vm273_vm1, %v271_v21 }
  0xed   : > { %v482_v22 = vpop.f32.mrb[0].mxu0 }
  0xee   : > { %336 = vst.msk [vmem:[%s233_s8 + $0x10] sm:$0xff] %vm333_vm2, %v482_v22  ;;  %v318_v23 = vpop.f32.mrb[1].mxu0  ;;  %v353_v27 = vmul.f32 %v482_v22, %v482_v22  ;;  %v341_v32 = vsel %vm333_vm2, %v482_v22, 0.0 }
  0xef   : > { %334 = vst.msk [vmem:[%s233_s8] sm:$0xff] %vm333_vm2, %v318_v23  ;;  %v351_v24 = vmul.f32 %v318_v23, %v318_v23  ;;  %v483_v25 = vpop.f32.mrb[2].mxu0  ;;  %v338_v28 = vsel %vm333_vm2, %v318_v23, 0.0 }
  0xf0   : > { %337 = vst.msk [vmem:[%s233_s8 + $0x18] sm:$0xff] %vm333_vm2, %v483_v25  ;;  %v321_v26 = vpop.f32.mrb[3].mxu0  ;;  %v354_v34 = vmul.f32 %v483_v25, %v483_v25  ;;  %v358_v38 = vsel %vm333_vm2, %v353_v27, 0.0  ;;  %v343_v39 = vsel %vm333_vm2, %v483_v25, 0.0 }
  0xf1   : > { %335 = vst.msk [vmem:[%s233_s8 + $0x8] sm:$0xff] %vm333_vm2, %v321_v26  ;;  %v339_v29 = vsel %vm333_vm2, %v321_v26, 0.0  ;;  %v352_v30 = vmul.f32 %v321_v26, %v321_v26  ;;  %v355_v33 = vsel %vm333_vm2, %v351_v24, 0.0 }
  0xf2   : > { %v340_v31 = vadd.f32 %v339_v29, %v338_v28  ;;  %v360_v42 = vsel %vm333_vm2, %v354_v34, 0.0 }
  0xf3   : > { %v356_v35 = vsel %vm333_vm2, %v352_v30, 0.0 }
  0xf4   : > { %v342_v36 = vadd.f32 %v341_v32, %v340_v31  ;;  %v357_v37 = vadd.f32 %v356_v35, %v355_v33 }
  0xf6   : > { %v344_v40 = vadd.f32 %v343_v39, %v342_v36  ;;  %v359_v41 = vadd.f32 %v358_v38, %v357_v37 }
  0xf8   : > { %v345_v43 = vrot.slane %v344_v40, 4  ;;  %v361_v44 = vadd.f32 %v360_v42, %v359_v41 }
  0xfa   : > { %v346_v45 = vadd.f32 %v345_v43, %v344_v40  ;;  %v362_v46 = vrot.slane %v361_v44, 4 }
  0xfc   : > { %v347_v47 = vrot.slane %v346_v45, 2  ;;  %v363_v48 = vadd.f32 %v362_v46, %v361_v44 }
  0xfe   : > { %v348_v49 = vadd.f32 %v347_v47, %v346_v45  ;;  %v364_v50 = vrot.slane %v363_v48, 2 }
 0x100   : > { %v349_v51 = vrot.slane %v348_v49, 1  ;;  %v365_v52 = vadd.f32 %v364_v50, %v363_v48 }
 0x102   : > { %v366_v53 = vrot.slane %v365_v52, 1  ;;  %v350_v54 = vadd.f32 %v349_v51, %v348_v49 }
 0x104   : > { %v367_v55 = vadd.f32 %v366_v53, %v365_v52 }
 0x106   : > { %v369_v56 = vsel %vm368_vm3, %v350_v54, %v367_v55 }
 0x107   : > { %371 = vst.msk [vmem:[%s238_s12] sm:$0x3] %vm370_vm4, %v369_v56 }
 0x108 PF: > { %s16_s18 = sadd.s32 1, %s499_s18  }
 0x109   : > { %p13_p5 = scmp.ge.s32.totalorder %s16_s18, 6  }
 0x10b   :  { %15 = sbr.rel (!%p13_p5) target bundleno = 1 (0x1), region = 78 }

// kernel: resnet_block.7
= control target key start
LH: loop header
LB: loop body
LE: loop exit
PB: predicated region body
PF: predicated region fallthrough
CT: control target
= control target key end

     0   :  { %s320_s15 = smov 0   ;;  %s364_s0 = inlined_call_operand.vmem [shape: f32[32,128], index: 0, kind: input, shape index: {}]   ;;  %s365_s1 = inlined_call_operand.vmem [shape: f32[32,128], index: 1, kind: input, shape index: {}]   ;;  %s366_s2 = inlined_call_operand.vmem [shape: f32[1,128], index: 2, kind: input, shape index: {}]   ;;  %s367_s3 = inlined_call_operand.vmem [shape: f32[1,128], index: 3, kind: input, shape index: {}]   ;;  %s368_s4 = inlined_call_operand.vmem [shape: f32[32,128], index: 4, kind: output, shape index: {}]  }
   0x1 LB: > { %s296_s16 = sadd.s32 4294967295, %s322_s15   ;;  %p300_p0 = scmp.ge.s32.totalorder %s322_s15, 1  ;;  %s322_s15 = sphi %s320_s15, %s14_s15  }
   0x2   : > { %p170_p1 = scmp.lt.s32.totalorder %s322_s15, 5 }
   0x4   : > { %p171_p2 = pnand %p300_p0, %p170_p1 }
   0x5   : > { %p198_p3 = scmp.lt.s32.totalorder (!%p171_p2), %s296_s16, 3  ;;  %v304_v0 = vld [vmem:[%s366_s2] ss:$0 sm:$0xff] (!%p171_p2) }
   0x6   : > { %174 = sbr.rel (%p171_p2) target bundleno = 26 (0x1a), region = 36  ;;  %v305_v2 = vld [vmem:[%s367_s3] ss:$0 sm:$0xff] (!%p171_p2) }
   0xd   : > { %s370_s16 = smov (!%p198_p3, %s296_s16), 3 }
   0xe   : > { %s301_s17 = sshll.u32 %s370_s16, 3 }
   0xf   : > { %s201_s22 = scalar_lea.vmem %s364_s0, %s301_s17  ;;  %s205_s25 = scalar_lea.vmem %s365_s1, %s301_s17 }
  0x10   : > { %v210_v1 = vld [vmem:[%s201_s22] sm:$0xff]  ;;  %s209_s30 = scalar_lea.vmem %s368_s4, %s301_s17 }
  0x11   : > { %v218_v3 = vmul.f32 %v304_v0, %v210_v1  ;;  %v227_v4 = vld [vmem:[%s205_s25] sm:$0xff] }
  0x13   : > { %v226_v5 = vadd.f32 %v305_v2, %v218_v3 }
  0x15   : > { %v228_v6 = vadd.f32 %v227_v4, %v226_v5 }
  0x17   : > { %v229_v7 = vmax.f32 %v228_v6, 0.0 }
  0x19   : > { %230 = vst [vmem:[%s209_s30] sm:$0xff] %v229_v7 }
  0x1a PF: > { %s14_s15 = sadd.s32 1, %s322_s15  }
  0x1b   : > { %p11_p4 = scmp.ge.s32.totalorder %s14_s15, 6  }
  0x1d   :  { %13 = sbr.rel (!%p11_p4) target bundleno = 1 (0x1), region = 69 }

// kernel: resnet_block.5
= control target key start
LH: loop header
LB: loop body
LE: loop exit
PB: predicated region body
PF: predicated region fallthrough
CT: control target
= control target key end

     0   :  { %s1282_s18 = smov 0   ;;  %s1674_s0 = inlined_call_operand.vmem [shape: f32[2,10,10,8], index: 0, kind: input, shape index: {}]   ;;  %s1675_s1 = inlined_call_operand.vmem [shape: f32[1,8], index: 1, kind: input, shape index: {}]   ;;  %s1676_s2 = inlined_call_operand.vmem [shape: f32[1,8], index: 2, kind: input, shape index: {}]   ;;  %s1677_s3 = inlined_call_operand.vmem [shape: bf16[72,8], index: 3, kind: input, shape index: {}]   ;;  %s1678_s4 = inlined_call_operand.vmem [shape: f32[2,8,8,8], index: 4, kind: output, shape index: {0}]   ;;  %s1679_s5 = inlined_call_operand.vmem [shape: f32[2,2,8], index: 5, kind: output, shape index: {1}]  }
   0x1 LB: > { %s990_s19 = sadd.s32 4294967295, %s1241_s18   ;;  %p994_p0 = scmp.ge.s32.totalorder %s1241_s18, 1  ;;  %s1241_s18 = sphi %s1282_s18, %s16_s18  }
   0x2   : > { %p190_p1 = scmp.lt.s32.totalorder %s1241_s18, 3 }
   0x4   : > { %p191_p2 = pnand %p994_p0, %p190_p1 }
   0x5   : > { %p222_p3 = scmp.lt.s32.totalorder (!%p191_p2), %s990_s19, 1  ;;  %v331_v0 = vlaneseq (!%p191_p2)  ;;  %v1298_v2 = vld [vmem:[%s1675_s1] ss:$0 sm:$0xff] (!%p191_p2)  ;;  %vm439_vm0 = vcmask (!%p191_p2), 1045504   ;;  %v1243_v8 = vmov (!%p191_p2), 0.0   ;;  %vm390_vm1 = vcmask (!%p191_p2), 1046528  }
   0x6   : > { %194 = sbr.rel (%p191_p2) target bundleno = 447 (0x1bf), region = 36  ;;  %v1311_v4 = vld [vmem:[%s1676_s2] ss:$0 sm:$0xff] (!%p191_p2)  ;;  %v1317_v9 = vrot.slane (!%p191_p2), %v1243_v8, 2  ;;  %v1320_v10 = vrot.slane (!%p191_p2), %v1243_v8, 1  ;;  %s1244_s28 = smov (!%p191_p2), 24  }
   0x7   : > { %v1292_v1 = vshrl.u32 (!%p191_p2), %v331_v0, 7  ;;  %s1245_s6 = smov (!%p191_p2), 16   ;;  %s1246_s7 = smov (!%p191_p2), 8   ;;  %vm773_vm4 = vcmask (!%p191_p2), 1043456   ;;  %vm648_vm5 = vcmask (!%p191_p2), 64512   ;;  %vm657_vm6 = vcmask (!%p191_p2), 130048  }
   0x8   : > { %s1247_s12 = smov (!%p191_p2), 32   ;;  %s1248_s15 = smov (!%p191_p2), 40   ;;  %vm666_vm7 = vcmask (!%p191_p2), 195584   ;;  %vm675_vm8 = vcmask (!%p191_p2), 261120   ;;  %vm684_vm9 = vcmask (!%p191_p2), 326656   ;;  %vm693_vm10 = vcmask (!%p191_p2), 392192  }
   0x9   : > { %v1301_v3 = vadd.s32 (!%p191_p2), 8, %v1292_v1  ;;  %vm334_vm2 = vcmp.ge.s32.totalorder (!%p191_p2), %v1292_v1, 1  ;;  %s1249_s16 = smov (!%p191_p2), 48   ;;  %s1250_s17 = smov (!%p191_p2), 56   ;;  %vm702_vm11 = vcmask (!%p191_p2), 457728   ;;  %vm711_vm12 = vcmask (!%p191_p2), 523264  }
   0xa   : > { %s1251_s22 = smov (!%p191_p2), 64   ;;  %vm760_vm13 = vcmask (!%p191_p2), 588800   ;;  %vm900_vm14 = vcmask (!%p191_p2), 1040384   ;;  %vm902_vm15 = vcmask (!%p191_p2), 58368  }
   0xb   : > { %vm341_vm3 = vcmp.le.s32.totalorder (!%p191_p2), %v1301_v3, 8 }
   0xd   : > { %s1681_s19 = smov (!%p222_p3, %s990_s19), 1 }
   0xe   : > { %s1052_s20 = smul.u32 160, %s1681_s19  ;;  %s1012_s23 = sshll.u32 %s1681_s19, 6 }
   0xf   : > { %s1633_s26 = scalar_lea.vmem %s1678_s4, %s1012_s23  ;;  %s998_s27 = sshll.u32 %s1681_s19, 1 }
  0x10   : > { %s1306_s25 = scalar_lea.vmem %s1674_s0, %s1052_s20  ;;  %s235_s30 = scalar_lea.vmem %s1679_s5, %s998_s27 }
  0x11   : > { %v243_v5 = vld [vmem:[%s1306_s25 + $0x30] sm:$0xff]  ;;  %v245_v6 = vld [vmem:[%s1306_s25 + $0x40] sm:$0xff]  ;;  %v240_v15 = vld [vmem:[%s1306_s25 + $0x18] sm:$0x3] }
  0x12   : > { %v239_v7 = vld [vmem:[%s1306_s25 + $0x10] sm:$0xff]  ;;  %v270_v11 = vmul.f32 %v1298_v2, %v243_v5  ;;  %v272_v12 = vmul.f32 %v1298_v2, %v245_v6  ;;  %v241_v13 = vld [vmem:[%s1306_s25 + $0x20] sm:$0xff]  ;;  %v242_v16 = vld [vmem:[%s1306_s25 + $0x28] sm:$0x3]  ;;  %v267_v18 = vmul.f32 %v1298_v2, %v240_v15 }
  0x13   : > { %v266_v14 = vmul.f32 %v1298_v2, %v239_v7  ;;  %v268_v17 = vmul.f32 %v1298_v2, %v241_v13  ;;  %v244_v19 = vld [vmem:[%s1306_s25 + $0x38] sm:$0x3]  ;;  %v269_v20 = vmul.f32 %v1298_v2, %v242_v16  ;;  %v246_v21 = vld [vmem:[%s1306_s25 + $0x48] sm:$0x3]  ;;  %v247_v6 = vld [vmem:[%s1306_s25 + $0x50] sm:$0xff] }
  0x14   : > { %v297_v22 = vadd.f32 %v1311_v4, %v270_v11  ;;  %v299_v23 = vadd.f32 %v1311_v4, %v272_v12  ;;  %v271_v25 = vmul.f32 %v1298_v2, %v244_v19  ;;  %v294_v27 = vadd.f32 %v1311_v4, %v267_v18  ;;  %v1230_v7 = vld [vmem:[%s1677_s3] sm:$0xff]   ;;  %v250_v19 = vld [vmem:[%s1306_s25 + $0x68] sm:$0x3] }
  0x15   : > { %v293_v24 = vadd.f32 %v1311_v4, %v266_v14  ;;  %v295_v26 = vadd.f32 %v1311_v4, %v268_v17  ;;  %v296_v28 = vadd.f32 %v1311_v4, %v269_v20  ;;  %v273_v29 = vmul.f32 %v1298_v2, %v246_v21  ;;  %v248_v14 = vld [vmem:[%s1306_s25 + $0x58] sm:$0x3]  ;;  %v249_v18 = vld [vmem:[%s1306_s25 + $0x60] sm:$0xff]  ;;  %1022 = vmatprep.subr.bf16.mxu0 %v1230_v7 }
  0x16   : > { %v317_v30 = vmax.f32 %v297_v22, 0.0  ;;  %v319_v31 = vmax.f32 %v299_v23, 0.0  ;;  %v298_v33 = vadd.f32 %v1311_v4, %v271_v25  ;;  %v314_v35 = vmax.f32 %v294_v27, 0.0  ;;  %v251_v23 = vld [vmem:[%s1306_s25 + $0x70] sm:$0xff]  ;;  %1023 = vmatpush3.bf16.msra.mxu0 %v1230_v7  ;;  %1040 = vmatprep.subr.bf16.mxu1 %v1230_v7  ;;  %v252_v27 = vld [vmem:[%s1306_s25 + $0x78] sm:$0x3] }
  0x17   : > { %v313_v32 = vmax.f32 %v293_v24, 0.0  ;;  %v315_v34 = vmax.f32 %v295_v26, 0.0  ;;  %v316_v36 = vmax.f32 %v296_v28, 0.0  ;;  %v300_v37 = vadd.f32 %v1311_v4, %v273_v29  ;;  %v1231_v28 = vld [vmem:[%s1677_s3 + $0x8] sm:$0xff]   ;;  %1045 = vmatpush3.bf16.msra.mxu1 %v1230_v7 }
  0x18   : > { %v1347_v38 = vsel %vm334_vm2, %v317_v30, 0.0  ;;  %v1351_v39 = vsel %vm334_vm2, %v319_v31, 0.0  ;;  %v318_v41 = vmax.f32 %v298_v33, 0.0  ;;  %v357_v44 = vsel %vm341_vm3, %v314_v35, 0.0  ;;  %1024 = vmatprep.subr.bf16.mxu0 %v1231_v28  ;;  %1041 = vmatprep.subr.bf16.mxu1 %v1231_v28 }
  0x19   : > { %v1355_v40 = vsel %vm334_vm2, %v313_v32, 0.0  ;;  %v1075_v42 = vpack.i.bf16 %v1351_v39, %v1347_v38  ;;  %v1361_v43 = vsel %vm334_vm2, %v315_v34, 0.0  ;;  %v444_v47 = vrot.slane %v357_v44, 2 }
  0x1a   : > { %v443_v45 = vrot.slane %v1355_v40, 2  ;;  %v1070_v46 = vpack.i.bf16 %v1361_v43, %v1355_v40  ;;  %v394_v48 = vrot.slane %v1355_v40, 1  ;;  %v395_v49 = vrot.slane %v357_v44, 1  ;;  %1025 = vmatpush3.bf16.msra.mxu0 %v1231_v28 }
  0x1b   : > { %1076 = vrot.lane.b32.xlu1 %v1075_v42, %s1244_s28  ;;  %v359_v50 = vsel %vm341_vm3, %v316_v36, 0.0  ;;  %v361_v51 = vsel %vm341_vm3, %v318_v41, 0.0  ;;  %v446_v52 = vrot.slane %v1361_v43, 2  ;;  %v449_v53 = vrot.slane %v1347_v38, 2  ;;  %1046 = vmatpush3.bf16.msra.mxu1 %v1231_v28 }
  0x1c   : > { %1071 = vrot.lane.b32.xlu0 %v1070_v46, %s1244_s28  ;;  %v1378_v54 = vsel %vm439_vm0, %v443_v45, %v444_v47  ;;  %v1381_v55 = vsel %vm390_vm1, %v394_v48, %v395_v49  ;;  %v447_v56 = vrot.slane %v359_v50, 2  ;;  %v450_v57 = vrot.slane %v361_v51, 2  ;;  %v1232_v48 = vld [vmem:[%s1677_s3 + $0x10] sm:$0xff]  }
  0x1d   : > { %v1090_v58 = vpack.i.bf16 %v1378_v54, %v1317_v9  ;;  %v1080_v59 = vpack.i.bf16 %v1381_v55, %v1320_v10  ;;  %v397_v60 = vrot.slane %v1361_v43, 1  ;;  %v398_v61 = vrot.slane %v359_v50, 1  ;;  %1026 = vmatprep.subr.bf16.mxu0 %v1232_v48  ;;  %1042 = vmatprep.subr.bf16.mxu1 %v1232_v48 }
  0x1e   : > { %v1389_v62 = vsel %vm439_vm0, %v446_v52, %v447_v56  ;;  %v1392_v63 = vsel %vm439_vm0, %v449_v53, %v450_v57  ;;  %v400_v0 = vrot.slane %v1347_v38, 1  ;;  %v401_v5 = vrot.slane %v361_v51, 1  ;;  %1027 = vmatpush3.bf16.msra.mxu0 %v1232_v48 }
  0x1f   : > { %1091 = vrot.lane.b32.xlu1 %v1090_v58, %s1245_s6  ;;  %v1402_v11 = vpack.i.bf16 %v1392_v63, %v1389_v62  ;;  %v399_v12 = vsel %vm390_vm1, %v397_v60, %v398_v61  ;;  %v320_v13 = vmax.f32 %v300_v37, 0.0  ;;  %v403_v16 = vrot.slane %v1351_v39, 1  ;;  %v253_v61 = vld [vmem:[%s1306_s25 + $0x80] sm:$0xff]  ;;  %1047 = vmatpush3.bf16.msra.mxu1 %v1232_v48 }
  0x20   : > { %1081 = vrot.lane.b32.xlu0 %v1080_v59, %s1246_s7  ;;  %v402_v15 = vsel %vm390_vm1, %v400_v0, %v401_v5  ;;  %v452_v17 = vrot.slane %v1351_v39, 2  ;;  %v274_v22 = vmul.f32 %v1298_v2, %v247_v6  ;;  %v275_v26 = vmul.f32 %v1298_v2, %v248_v14  ;;  %v1233_v0 = vld [vmem:[%s1677_s3 + $0x18] sm:$0xff]  }
  0x21   : > { %v1412_v20 = vpack.i.bf16 %v402_v15, %v399_v12  ;;  %v363_v21 = vsel %vm341_vm3, %v320_v13, 0.0  ;;  %v1100_v29 = vpack.i.bf16 %v399_v12, %v1381_v55  ;;  %v276_v31 = vmul.f32 %v1298_v2, %v249_v18  ;;  %1028 = vmatprep.subr.bf16.mxu0 %v1233_v0  ;;  %1043 = vmatprep.subr.bf16.mxu1 %v1233_v0 }
  0x22   : > { %v404_v24 = vrot.slane %v363_v21, 1  ;;  %v453_v25 = vrot.slane %v363_v21, 2  ;;  %v301_v30 = vadd.f32 %v1311_v4, %v274_v22  ;;  %v277_v32 = vmul.f32 %v1298_v2, %v250_v19  ;;  %1029 = vmatpush3.bf16.msra.mxu0 %v1233_v0 }
  0x23   : > { %1096 = vrot.lane.b32.xlu1 %v1402_v11, %s1245_s6  ;;  %v302_v35 = vadd.f32 %v1311_v4, %v275_v26  ;;  %v278_v36 = vmul.f32 %v1298_v2, %v251_v23  ;;  %v279_v42 = vmul.f32 %v1298_v2, %v252_v27  ;;  %v303_v45 = vadd.f32 %v1311_v4, %v276_v31  ;;  %v1234_v27 = vld [vmem:[%s1677_s3 + $0x20] ss:$0 sps:$4 sm:$0xff]  }
  0x24   : > { %1086 = vrot.lane.b32.xlu0 %v1412_v20, %s1246_s7  ;;  %v405_v33 = vsel %vm390_vm1, %v403_v16, %v404_v24  ;;  %v1433_v34 = vsel %vm439_vm0, %v452_v17, %v453_v25  ;;  %v321_v41 = vmax.f32 %v301_v30, 0.0  ;;  %v304_v46 = vadd.f32 %v1311_v4, %v277_v32  ;;  %1048 = vmatpush3.bf16.msra.mxu1 %v1233_v0 }
  0x25   : > { %v1105_v37 = vpack.i.bf16 %v405_v33, %v402_v15  ;;  %v322_v44 = vmax.f32 %v302_v35, 0.0  ;;  %v305_v47 = vadd.f32 %v1311_v4, %v278_v36  ;;  %v1120_v49 = vpack.i.bf16 %v1433_v34, %v1392_v63  ;;  %v254_v63 = vld [vmem:[%s1306_s25 + $0x88] sm:$0x3]  ;;  %1050 = vmatprep.subr.msk.bf16.mxu0 %vm773_vm4, %v1234_v27  ;;  %1051 = vmatprep.subr.msk.bf16.mxu1 %vm773_vm4, %v1234_v27 }
  0x26   : > { %v1449_v50 = vsel %vm334_vm2, %v321_v41, 0.0  ;;  %v306_v51 = vadd.f32 %v1311_v4, %v279_v42  ;;  %v1110_v52 = vpack.i.bf16 %v1389_v62, %v1378_v54  ;;  %v323_v56 = vmax.f32 %v303_v45, 0.0 }
  0x27   : > { %1106 = vrot.lane.b32.xlu1 %v1105_v37, %s1247_s12  ;;  %v365_v53 = vsel %vm341_vm3, %v322_v44, 0.0  ;;  %v406_v55 = vrot.slane %v1449_v50, 1  ;;  %v324_v58 = vmax.f32 %v304_v46, 0.0  ;;  %v325_v59 = vmax.f32 %v305_v47, 0.0 }
  0x28   : > { %1101 = vrot.lane.b32.xlu0 %v1100_v29, %s1247_s12  ;;  %v407_v57 = vrot.slane %v365_v53, 1  ;;  %v326_v60 = vmax.f32 %v306_v51, 0.0  ;;  %v1125_v54 = vpack.i.bf16 %v1449_v50, %v1351_v39  ;;  %v1115_v62 = vpack.i.bf16 %v1347_v38, %v1361_v43 }
  0x29   : > { %v1474_v6 = vsel %vm334_vm2, %v323_v56, 0.0  ;;  %v367_v7 = vsel %vm341_vm3, %v324_v58, 0.0  ;;  %v1480_v12 = vsel %vm334_vm2, %v325_v59, 0.0  ;;  %v280_v14 = vmul.f32 %v1298_v2, %v253_v61 }
  0x2a   : > { %v1470_v5 = vsel %vm390_vm1, %v406_v55, %v407_v57  ;;  %v369_v13 = vsel %vm341_vm3, %v326_v60, 0.0  ;;  %v281_v15 = vmul.f32 %v1298_v2, %v254_v63  ;;  %v409_v17 = vrot.slane %v1474_v6, 1 }
  0x2b   : > { %1121 = vrot.lane.b32.xlu1 %v1120_v49, %s1248_s15  ;;  %v1135_v16 = vpack.i.bf16 %v1470_v5, %v405_v33  ;;  %v410_v18 = vrot.slane %v367_v7, 1  ;;  %v412_v19 = vrot.slane %v1480_v12, 1  ;;  %v413_v21 = vrot.slane %v369_v13, 1 }
  0x2c   : > { %1111 = vrot.lane.b32.xlu0 %v1110_v52, %s1248_s15  ;;  %v455_v22 = vrot.slane %v1449_v50, 2  ;;  %v456_v23 = vrot.slane %v365_v53, 2  ;;  %v307_v2 = vadd.f32 %v1311_v4, %v280_v14  ;;  %v308_v24 = vadd.f32 %v1311_v4, %v281_v15 }
  0x2d   : > { %v411_v25 = vsel %vm390_vm1, %v409_v17, %v410_v18  ;;  %v458_v26 = vrot.slane %v1474_v6, 2  ;;  %v414_v28 = vsel %vm390_vm1, %v412_v19, %v413_v21  ;;  %v459_v29 = vrot.slane %v367_v7, 2 }
  0x2e   : > { %v461_v30 = vrot.slane %v1480_v12, 2  ;;  %v462_v4 = vrot.slane %v369_v13, 2  ;;  %v457_v31 = vsel %vm439_vm0, %v455_v22, %v456_v23  ;;  %v327_v32 = vmax.f32 %v307_v2, 0.0 }
  0x2f   : > { %1126 = vrot.lane.b32.xlu1 %v1125_v54, %s1249_s16  ;;  %v328_v33 = vmax.f32 %v308_v24, 0.0  ;;  %v1155_v35 = vpack.i.bf16 %v414_v28, %v411_v25  ;;  %v775_v36 = vsel %vm773_vm4, %v1234_v27, 0  ;;  %v460_v37 = vsel %vm439_vm0, %v458_v26, %v459_v29 }
  0x30   : > { %1116 = vrot.lane.b32.xlu0 %v1115_v62, %s1249_s16  ;;  %v463_v41 = vsel %vm439_vm0, %v461_v30, %v462_v4  ;;  %v370_v42 = vsel %vm334_vm2, %v327_v32, 0.0  ;;  %1031 = vmatpush3.bf16.msra.mxu0 %v775_v36  ;;  %v1170_v1 = vpack.i.bf16 %v1474_v6, %v1449_v50  ;;  %v1180_v51 = vpack.i.bf16 %v411_v25, %v1470_v5 }
  0x31   : > { %v371_v44 = vsel %vm341_vm3, %v328_v33, 0.0  ;;  %1049 = vmatpush3.bf16.msra.mxu1 %v775_v36  ;;  %v1165_v45 = vpack.i.bf16 %v463_v41, %v460_v37  ;;  %v1175_v46 = vpack.i.bf16 %v370_v42, %v1480_v12  ;;  %v541_v47 = vrot.slane %v370_v42, 2 }
  0x32   : > { %v542_v48 = vrot.slane %v371_v44, 2  ;;  %v1190_v55 = vpack.i.bf16 %v460_v37, %v457_v31  ;;  %v1205_v56 = vpack.i.bf16 %v1243_v8, %v370_v42  ;;  %v1200_v57 = vpack.i.bf16 %v1480_v12, %v1474_v6 }
  0x33   : > { %1136 = vrot.lane.b32.xlu1 %v1135_v16, %s1250_s17 }
  0x34   : > { %1131 = vrot.lane.b32.xlu0 %v1412_v20, %s1250_s17  ;;  %v1150_v20 = vpack.i.bf16 %v457_v31, %v1433_v34  ;;  %v515_v34 = vrot.slane %v371_v44, 1  ;;  %v543_v52 = vsel %vm439_vm0, %v541_v47, %v542_v48 }
  0x35   : > { %v1195_v53 = vpack.i.bf16 %v543_v52, %v463_v41  ;;  %v1225_v59 = vpack.i.bf16 %v1317_v9, %v543_v52 }
  0x37   : > { %1146 = vrot.lane.b32.xlu1 %v1135_v16, %s1246_s7 }
  0x38   : > { %1141 = vrot.lane.b32.xlu0 %v1402_v11, %s1251_s22  ;;  %v514_v11 = vrot.slane %v370_v42, 1 }
  0x3a   : > { %v516_v3 = vsel %vm390_vm1, %v514_v11, %v515_v34 }
  0x3b   : > { %1156 = vrot.lane.b32.xlu1 %v1155_v35, %s1246_s7  ;;  %v1185_v49 = vpack.i.bf16 %v516_v3, %v414_v28  ;;  %v1215_v58 = vpack.i.bf16 %v1320_v10, %v516_v3 }
  0x3c   : > { %1151 = vrot.lane.b32.xlu0 %v1150_v20, %s1251_s22 }
  0x3f   : > { %1166 = vrot.lane.b32.xlu1 %v1165_v45, %s1245_s6 }
  0x40   : > { %1161 = vrot.lane.b32.xlu0 %v1150_v20, %s1245_s6 }
  0x43   : > { %1176 = vrot.lane.b32.xlu1 %v1175_v46, %s1244_s28 }
  0x44   : > { %1171 = vrot.lane.b32.xlu0 %v1170_v1, %s1244_s28 }
  0x47   : > { %1186 = vrot.lane.b32.xlu1 %v1185_v49, %s1247_s12 }
  0x48   : > { %1181 = vrot.lane.b32.xlu0 %v1180_v51, %s1247_s12 }
  0x4b   : > { %1196 = vrot.lane.b32.xlu1 %v1195_v53, %s1248_s15 }
  0x4c   : > { %1191 = vrot.lane.b32.xlu0 %v1190_v55, %s1248_s15 }
  0x4f   : > { %1206 = vrot.lane.b32.xlu1 %v1205_v56, %s1249_s16 }
  0x50   : > { %1201 = vrot.lane.b32.xlu0 %v1200_v57, %s1249_s16 }
  0x53   : > { %1216 = vrot.lane.b32.xlu1 %v1215_v58, %s1250_s17 }
  0x54   : > { %1211 = vrot.lane.b32.xlu0 %v1155_v35, %s1250_s17 }
  0x57   : > { %1226 = vrot.lane.b32.xlu1 %v1225_v59, %s1251_s22 }
  0x58   : > { %1221 = vrot.lane.b32.xlu0 %v1165_v45, %s1251_s22 }
  0x8d   : > { %v1077_v8 = vpop.permute.xlu1 %1076 }
  0x8e   : > { %v1072_v60 = vpop.permute.xlu0 %1071  ;;  %v1079_v27 = vunpack.i.h.bf16 %v1077_v8  ;;  %v1078_v28 = vunpack.i.l.bf16 %v1077_v8 }
  0x8f   : > { %v1074_v29 = vunpack.i.h.bf16 %v1072_v60  ;;  %v1073_v30 = vunpack.i.l.bf16 %v1072_v60 }
  0x91   : > { %v1092_v61 = vpop.permute.xlu1 %1091 }
  0x92   : > { %v1082_v63 = vpop.permute.xlu0 %1081  ;;  %v1094_v16 = vunpack.i.h.bf16 %v1092_v61  ;;  %v1093_v17 = vunpack.i.l.bf16 %v1092_v61 }
  0x93   : > { %v1084_v5 = vunpack.i.h.bf16 %v1082_v63  ;;  %v1083_v7 = vunpack.i.l.bf16 %v1082_v63 }
  0x95   : > { %v1097_v0 = vpop.permute.xlu1 %1096  ;;  %v650_v18 = vsel %vm648_vm5, %v1355_v40, %v1084_v5  ;;  %v649_v19 = vsel %vm648_vm5, 0.0, %v1083_v7 }
  0x96   : > { %v1087_v54 = vpop.permute.xlu0 %1086  ;;  %v1099_v21 = vunpack.i.h.bf16 %v1097_v0  ;;  %v1098_v22 = vunpack.i.l.bf16 %v1097_v0  ;;  %v659_v26 = vsel %vm657_vm6, %v650_v18, %v1094_v16  ;;  %v658_v40 = vsel %vm657_vm6, %v649_v19, %v1093_v17 }
  0x97   : > { %v1089_v9 = vunpack.i.h.bf16 %v1087_v54  ;;  %v1088_v14 = vunpack.i.l.bf16 %v1087_v54  ;;  %v667_v33 = vsel %vm666_vm7, %v658_v40, %v1073_v30  ;;  %v668_v35 = vsel %vm666_vm7, %v659_v26, %v1074_v29 }
  0x99   : > { %v1542_v62 = vpop.permute.xlu1 %1106  ;;  %v652_v2 = vsel %vm648_vm5, %v1347_v38, %v1089_v9  ;;  %v651_v24 = vsel %vm648_vm5, %v1361_v43, %v1088_v14 }
  0x9a   : > { %v1102_v10 = vpop.permute.xlu0 %1101  ;;  %v661_v4 = vsel %vm657_vm6, %v652_v2, %v1099_v21  ;;  %v660_v38 = vsel %vm657_vm6, %v651_v24, %v1098_v22  ;;  %v1109_v41 = vunpack.i.h.bf16 %v1542_v62  ;;  %v1108_v42 = vunpack.i.l.bf16 %v1542_v62 }
  0x9b   : > { %v1104_v31 = vunpack.i.h.bf16 %v1102_v10  ;;  %v1103_v32 = vunpack.i.l.bf16 %v1102_v10  ;;  %v669_v11 = vsel %vm666_vm7, %v660_v38, %v1078_v28  ;;  %v670_v34 = vsel %vm666_vm7, %v661_v4, %v1079_v27 }
  0x9c   : > { %v678_v62 = vsel %vm675_vm8, %v669_v11, %v1108_v42  ;;  %v679_v10 = vsel %vm675_vm8, %v670_v34, %v1109_v41 }
  0x9d   : > { %v1544_v13 = vpop.permute.xlu1 %1121  ;;  %v676_v3 = vsel %vm675_vm8, %v667_v33, %v1103_v32  ;;  %v677_v47 = vsel %vm675_vm8, %v668_v35, %v1104_v31 }
  0x9e   : > { %v1112_v15 = vpop.permute.xlu0 %1111  ;;  %v1124_v48 = vunpack.i.h.bf16 %v1544_v13  ;;  %v1123_v49 = vunpack.i.l.bf16 %v1544_v13 }
  0x9f   : > { %v1114_v36 = vunpack.i.h.bf16 %v1112_v15  ;;  %v1113_v20 = vunpack.i.l.bf16 %v1112_v15 }
  0xa0   : > { %v687_v9 = vsel %vm684_vm9, %v678_v62, %v1123_v49  ;;  %v688_v14 = vsel %vm684_vm9, %v679_v10, %v1124_v48 }
  0xa1   : > { %v1549_v23 = vpop.permute.xlu1 %1126  ;;  %v685_v52 = vsel %vm684_vm9, %v676_v3, %v1113_v20  ;;  %v686_v53 = vsel %vm684_vm9, %v677_v47, %v1114_v36 }
  0xa2   : > { %v1117_v25 = vpop.permute.xlu0 %1116  ;;  %v1129_v55 = vunpack.i.h.bf16 %v1549_v23  ;;  %v1128_v56 = vunpack.i.l.bf16 %v1549_v23 }
  0xa3   : > { %v1119_v44 = vunpack.i.h.bf16 %v1117_v25  ;;  %v1118_v45 = vunpack.i.l.bf16 %v1117_v25 }
  0xa4   : > { %v696_v17 = vsel %vm693_vm10, %v687_v9, %v1128_v56  ;;  %v697_v18 = vsel %vm693_vm10, %v688_v14, %v1129_v55 }
  0xa5   : > { %v1137_v43 = vpop.permute.xlu1 %1136  ;;  %v694_v58 = vsel %vm693_vm10, %v685_v52, %v1118_v45  ;;  %v695_v59 = vsel %vm693_vm10, %v686_v53, %v1119_v44 }
  0xa6   : > { %v1132_v37 = vpop.permute.xlu0 %1131  ;;  %v1139_v61 = vunpack.i.h.bf16 %v1137_v43  ;;  %v1138_v63 = vunpack.i.l.bf16 %v1137_v43 }
  0xa7   : > { %v1134_v46 = vunpack.i.h.bf16 %v1132_v37  ;;  %v1133_v1 = vunpack.i.l.bf16 %v1132_v37 }
  0xa8   : > { %v705_v22 = vsel %vm702_vm11, %v696_v17, %v1138_v63  ;;  %v706_v23 = vsel %vm702_vm11, %v697_v18, %v1139_v61 }
  0xa9   : > { %v1147_v51 = vpop.permute.xlu1 %1146  ;;  %v703_v0 = vsel %vm702_vm11, %v694_v58, %v1133_v1  ;;  %v704_v54 = vsel %vm702_vm11, %v695_v59, %v1134_v46 }
  0xaa   : > { %v1142_v57 = vpop.permute.xlu0 %1141  ;;  %v1149_v31 = vunpack.i.h.bf16 %v1147_v51  ;;  %v1148_v32 = vunpack.i.l.bf16 %v1147_v51 }
  0xab   : > { %v1144_v8 = vunpack.i.h.bf16 %v1142_v57  ;;  %v1143_v60 = vunpack.i.l.bf16 %v1142_v57 }
  0xac   : > { %v654_v46 = vsel %vm648_vm5, %v1449_v50, %v1149_v31  ;;  %v653_v1 = vsel %vm648_vm5, %v1351_v39, %v1148_v32 }
  0xad   : > { %v1157_v5 = vpop.permute.xlu1 %1156  ;;  %v712_v7 = vsel %vm711_vm12, %v703_v0, %v1143_v60  ;;  %v713_v13 = vsel %vm711_vm12, %v704_v54, %v1144_v8 }
  0xae   : > { %v1152_v15 = vpop.permute.xlu0 %1151  ;;  %v720_v16 = vpack.c.bf16 %v713_v13, %v712_v7  ;;  %v1159_v4 = vunpack.i.h.bf16 %v1157_v5  ;;  %v1158_v38 = vunpack.i.l.bf16 %v1157_v5 }
  0xaf   : > { %v1154_v19 = vunpack.i.h.bf16 %v1152_v15  ;;  %v1153_v21 = vunpack.i.l.bf16 %v1152_v15 }
  0xb0   : > { %1032 = vmatprep.mubr.msk.bf16.mxu0 %vm760_vm13, %v720_v16  ;;  %v656_v44 = vsel %vm648_vm5, %v1480_v12, %v1159_v4  ;;  %v655_v45 = vsel %vm648_vm5, %v1474_v6, %v1158_v38 }
  0xb1   : > { %v714_v2 = vsel %vm711_vm12, %v705_v22, %v1153_v21  ;;  %v715_v24 = vsel %vm711_vm12, %v706_v23, %v1154_v19  ;;  %v1167_v25 = vpop.permute.xlu1 %1166 }
  0xb2   : > { %v721_v26 = vpack.c.bf16 %v715_v24, %v714_v2  ;;  %v1162_v40 = vpop.permute.xlu0 %1161  ;;  %v1169_v43 = vunpack.i.h.bf16 %v1167_v25  ;;  %v1168_v33 = vunpack.i.l.bf16 %v1167_v25 }
  0xb3   : > { %v1164_v36 = vunpack.i.h.bf16 %v1162_v40  ;;  %v1163_v20 = vunpack.i.l.bf16 %v1162_v40 }
  0xb4   : > { %1033 = vmatmul.mubr.msk.bf16.vlgmr.msra.gmra.mrb[0].mxu0 %vm760_vm13, %v721_v26  ;;  %v664_v3 = vsel %vm657_vm6, %v655_v45, %v1168_v33  ;;  %v665_v47 = vsel %vm657_vm6, %v656_v44, %v1169_v43 }
  0xb5   : > { %v1177_v27 = vpop.permute.xlu1 %1176  ;;  %v663_v49 = vsel %vm657_vm6, %v654_v46, %v1164_v36  ;;  %v662_v12 = vsel %vm657_vm6, %v653_v1, %v1163_v20 }
  0xb6   : > { %v1172_v28 = vpop.permute.xlu0 %1171  ;;  %v1179_v41 = vunpack.i.h.bf16 %v1177_v27  ;;  %v1178_v42 = vunpack.i.l.bf16 %v1177_v27 }
  0xb7   : > { %v1174_v11 = vunpack.i.h.bf16 %v1172_v28  ;;  %v1173_v34 = vunpack.i.l.bf16 %v1172_v28 }
  0xb8   : > { %v673_v53 = vsel %vm666_vm7, %v664_v3, %v1178_v42  ;;  %v674_v55 = vsel %vm666_vm7, %v665_v47, %v1179_v41 }
  0xb9   : > { %v1187_v29 = vpop.permute.xlu1 %1186  ;;  %v671_v39 = vsel %vm666_vm7, %v662_v12, %v1173_v34  ;;  %v672_v57 = vsel %vm666_vm7, %v663_v49, %v1174_v11 }
  0xba   : > { %v1182_v30 = vpop.permute.xlu0 %1181  ;;  %v1189_v51 = vunpack.i.h.bf16 %v1187_v29  ;;  %v1188_v52 = vunpack.i.l.bf16 %v1187_v29 }
  0xbb   : > { %v1184_v50 = vunpack.i.h.bf16 %v1182_v30  ;;  %v1183_v56 = vunpack.i.l.bf16 %v1182_v30 }
  0xbc   : > { %v682_v54 = vsel %vm675_vm8, %v673_v53, %v1188_v52  ;;  %v683_v62 = vsel %vm675_vm8, %v674_v55, %v1189_v51 }
  0xbd   : > { %v1197_v35 = vpop.permute.xlu1 %1196  ;;  %v680_v13 = vsel %vm675_vm8, %v671_v39, %v1183_v56  ;;  %v681_v9 = vsel %vm675_vm8, %v672_v57, %v1184_v50 }
  0xbe   : > { %v1192_v37 = vpop.permute.xlu0 %1191  ;;  %v1199_v58 = vunpack.i.h.bf16 %v1197_v35  ;;  %v1198_v59 = vunpack.i.l.bf16 %v1197_v35 }
  0xbf   : > { %v1194_v8 = vunpack.i.h.bf16 %v1192_v37  ;;  %v1193_v60 = vunpack.i.l.bf16 %v1192_v37 }
  0xc0   : > { %v691_v16 = vsel %vm684_vm9, %v682_v54, %v1198_v59  ;;  %v692_v17 = vsel %vm684_vm9, %v683_v62, %v1199_v58 }
  0xc1   : > { %v1207_v48 = vpop.permute.xlu1 %1206  ;;  %v689_v21 = vsel %vm684_vm9, %v680_v13, %v1193_v60  ;;  %v690_v22 = vsel %vm684_vm9, %v681_v9, %v1194_v8 }
  0xc2   : > { %v1202_v6 = vpop.permute.xlu0 %1201  ;;  %v1209_v61 = vunpack.i.h.bf16 %v1207_v48  ;;  %v1208_v63 = vunpack.i.l.bf16 %v1207_v48 }
  0xc3   : > { %v1204_v10 = vunpack.i.h.bf16 %v1202_v6  ;;  %v1203_v5 = vunpack.i.l.bf16 %v1202_v6 }
  0xc4   : > { %v700_v23 = vsel %vm693_vm10, %v691_v16, %v1208_v63  ;;  %v701_v2 = vsel %vm693_vm10, %v692_v17, %v1209_v61 }
  0xc5   : > { %v1217_v0 = vpop.permute.xlu1 %1216  ;;  %v698_v25 = vsel %vm693_vm10, %v689_v21, %v1203_v5  ;;  %v699_v26 = vsel %vm693_vm10, %v690_v22, %v1204_v10 }
  0xc6   : > { %v1212_v7 = vpop.permute.xlu0 %1211  ;;  %v1219_v14 = vunpack.i.h.bf16 %v1217_v0  ;;  %v1218_v15 = vunpack.i.l.bf16 %v1217_v0 }
  0xc7   : > { %v1214_v18 = vunpack.i.h.bf16 %v1212_v7  ;;  %v1213_v19 = vunpack.i.l.bf16 %v1212_v7 }
  0xc8   : > { %v709_v29 = vsel %vm702_vm11, %v700_v23, %v1218_v15  ;;  %v710_v30 = vsel %vm702_vm11, %v701_v2, %v1219_v14 }
  0xc9   : > { %v1227_v24 = vpop.permute.xlu1 %1226  ;;  %v707_v43 = vsel %vm702_vm11, %v698_v25, %v1213_v19  ;;  %v708_v33 = vsel %vm702_vm11, %v699_v26, %v1214_v18 }
  0xca   : > { %v1229_v40 = vunpack.i.h.bf16 %v1227_v24  ;;  %v1228_v27 = vunpack.i.l.bf16 %v1227_v24  ;;  %v1222_v28 = vpop.permute.xlu0 %1221 }
  0xcb   : > { %v1224_v4 = vunpack.i.h.bf16 %v1222_v28  ;;  %v1223_v38 = vunpack.i.l.bf16 %v1222_v28 }
  0xcc   : > { %v718_v31 = vsel %vm711_vm12, %v709_v29, %v1228_v27  ;;  %v719_v32 = vsel %vm711_vm12, %v710_v30, %v1229_v40 }
  0xcd   : > { %v723_v35 = vpack.c.bf16 %v719_v32, %v718_v31  ;;  %v716_v36 = vsel %vm711_vm12, %v707_v43, %v1223_v38  ;;  %v717_v20 = vsel %vm711_vm12, %v708_v33, %v1224_v4 }
  0xce   : > { %v722_v37 = vpack.c.bf16 %v717_v20, %v716_v36 }
  0xd0   : > { %1036 = vmatprep.mubr.msk.bf16.mxu1 %vm760_vm13, %v722_v37 }
  0xd1   : > { %1037 = vmatmul.mubr.msk.bf16.vlgmr.msra.gmra.mrb[0].mxu1 %vm760_vm13, %v723_v35 }
 0x187   : > { %v1034_v41 = vpop.f32.mrb[0].mxu0 }
 0x188   : > { %844 = vst.msk [vmem:[%s1633_s26 + $0x10] sm:$0xff] %vm648_vm5, %v1034_v41  ;;  %v811_v42 = vpop.f32.mrb[1].mxu0  ;;  %v873_v34 = vmul.f32 %v1034_v41, %v1034_v41  ;;  %v853_v48 = vsel %vm648_vm5, %v1034_v41, 0.0 }
 0x189   : > { %842 = vst.msk [vmem:[%s1633_s26] sm:$0xff] %vm648_vm5, %v811_v42  ;;  %v871_v44 = vmul.f32 %v811_v42, %v811_v42  ;;  %v1035_v45 = vpop.f32.mrb[2].mxu0  ;;  %v850_v46 = vsel %vm648_vm5, %v811_v42, 0.0 }
 0x18a   : > { %845 = vst.msk [vmem:[%s1633_s26 + $0x18] sm:$0xff] %vm648_vm5, %v1035_v45  ;;  %v814_v11 = vpop.f32.mrb[3].mxu0  ;;  %v874_v12 = vmul.f32 %v1035_v45, %v1035_v45  ;;  %v882_v53 = vsel %vm648_vm5, %v873_v34, 0.0  ;;  %v855_v55 = vsel %vm648_vm5, %v1035_v45, 0.0 }
 0x18b   : > { %843 = vst.msk [vmem:[%s1633_s26 + $0x8] sm:$0xff] %vm648_vm5, %v814_v11  ;;  %v851_v1 = vsel %vm648_vm5, %v814_v11, 0.0  ;;  %v872_v3 = vmul.f32 %v814_v11, %v814_v11  ;;  %v879_v49 = vsel %vm648_vm5, %v871_v44, 0.0 }
 0x18c   : > { %v852_v47 = vadd.f32 %v851_v1, %v850_v46  ;;  %v884_v39 = vsel %vm648_vm5, %v874_v12, 0.0 }
 0x18d   : > { %v880_v51 = vsel %vm648_vm5, %v872_v3, 0.0 }
 0x18e   : > { %v854_v52 = vadd.f32 %v853_v48, %v852_v47  ;;  %v881_v6 = vadd.f32 %v880_v51, %v879_v49 }
 0x190   : > { %v883_v50 = vadd.f32 %v882_v53, %v881_v6  ;;  %v856_v56 = vadd.f32 %v855_v55, %v854_v52 }
 0x192   : > { %v885_v57 = vadd.f32 %v884_v39, %v883_v50 }
 0x1a4   : > { %v1038_v58 = vpop.f32.mrb[0].mxu1 }
 0x1a5   : > { %848 = vst.msk [vmem:[%s1633_s26 + $0x30] sm:$0xff] %vm648_vm5, %v1038_v58  ;;  %v827_v59 = vpop.f32.mrb[1].mxu1  ;;  %v877_v54 = vmul.f32 %v1038_v58, %v1038_v58  ;;  %v861_v9 = vsel %vm648_vm5, %v1038_v58, 0.0 }
 0x1a6   : > { %846 = vst.msk [vmem:[%s1633_s26 + $0x20] sm:$0xff] %vm648_vm5, %v827_v59  ;;  %v857_v8 = vsel %vm648_vm5, %v827_v59, 0.0  ;;  %v875_v60 = vmul.f32 %v827_v59, %v827_v59  ;;  %v1039_v61 = vpop.f32.mrb[2].mxu1 }
 0x1a7   : > { %v858_v63 = vadd.f32 %v857_v8, %v856_v56  ;;  %849 = vst.msk [vmem:[%s1633_s26 + $0x38] sm:$0xff] %vm648_vm5, %v1039_v61  ;;  %v830_v0 = vpop.f32.mrb[3].mxu1  ;;  %v878_v14 = vmul.f32 %v1039_v61, %v1039_v61  ;;  %v890_v18 = vsel %vm648_vm5, %v877_v54, 0.0  ;;  %v863_v19 = vsel %vm648_vm5, %v1039_v61, 0.0 }
 0x1a8   : > { %v886_v62 = vsel %vm648_vm5, %v875_v60, 0.0  ;;  %847 = vst.msk [vmem:[%s1633_s26 + $0x28] sm:$0xff] %vm648_vm5, %v830_v0  ;;  %v859_v10 = vsel %vm648_vm5, %v830_v0, 0.0  ;;  %v876_v5 = vmul.f32 %v830_v0, %v830_v0 }
 0x1a9   : > { %v887_v7 = vadd.f32 %v886_v62, %v885_v57  ;;  %v860_v13 = vadd.f32 %v859_v10, %v858_v63  ;;  %v892_v23 = vsel %vm648_vm5, %v878_v14, 0.0 }
 0x1aa   : > { %v888_v15 = vsel %vm648_vm5, %v876_v5, 0.0 }
 0x1ab   : > { %v862_v16 = vadd.f32 %v861_v9, %v860_v13  ;;  %v889_v17 = vadd.f32 %v888_v15, %v887_v7 }
 0x1ad   : > { %v864_v21 = vadd.f32 %v863_v19, %v862_v16  ;;  %v891_v22 = vadd.f32 %v890_v18, %v889_v17 }
 0x1af   : > { %v865_v2 = vrot.slane %v864_v21, 4  ;;  %v893_v24 = vadd.f32 %v892_v23, %v891_v22 }
 0x1b1   : > { %v866_v25 = vadd.f32 %v865_v2, %v864_v21  ;;  %v894_v26 = vrot.slane %v893_v24, 4 }
 0x1b3   : > { %v867_v40 = vrot.slane %v866_v25, 2  ;;  %v895_v27 = vadd.f32 %v894_v26, %v893_v24 }
 0x1b5   : > { %v868_v28 = vadd.f32 %v867_v40, %v866_v25  ;;  %v896_v29 = vrot.slane %v895_v27, 2 }
 0x1b7   : > { %v869_v30 = vrot.slane %v868_v28, 1  ;;  %v897_v4 = vadd.f32 %v896_v29, %v895_v27 }
 0x1b9   : > { %v898_v38 = vrot.slane %v897_v4, 1  ;;  %v870_v31 = vadd.f32 %v869_v30, %v868_v28 }
 0x1bb   : > { %v899_v32 = vadd.f32 %v898_v38, %v897_v4 }
 0x1bd   : > { %v901_v43 = vsel %vm900_vm14, %v870_v31, %v899_v32 }
 0x1be   : > { %903 = vst.msk [vmem:[%s235_s30] sm:$0x3] %vm902_vm15, %v901_v43 }
 0x1bf PF: > { %s16_s18 = sadd.s32 1, %s1241_s18  }
 0x1c0   : > { %p13_p4 = scmp.ge.s32.totalorder %s16_s18, 4  }
 0x1c2   :  { %15 = sbr.rel (!%p13_p4) target bundleno = 1 (0x1), region = 78 }

</bundles_post_ra>
